<compile_context>
chip_gen: v7x
topology: tpu7x:2x2x1
jax: 0.10.0
libtpu: 0.0.40
codegen_flags: <defaults>
</compile_context>

<pallas_src>
import functools

import jax
import jax.numpy as jnp
from jax.experimental import pallas as pl
from jax.experimental.pallas import tpu as pltpu


OUT_PAD = 128  # lane-dense padded classifier width (sliced to output_size in wrapper)


# ----------------------------- Fused Pallas kernel ---------------------------

def _bert_fused_kernel(
    emb_ref,                       # [1, S, H]   embeddings for one batch element
    eg_ref, ebias_ref,             # [1, H]      embedding LayerNorm gamma / beta
    wqkv_ref, bqkv_ref,            # [L, H, 3H], [L, 1, 3H]   fused QKV
    wo_ref, bo_ref,                # [L, H, H],  [L, 1, H]
    ln1g_ref, ln1b_ref,            # [L, 1, H]
    w1_ref, b1_ref,                # [L, H, I],  [L, 1, I]
    w2_ref, b2_ref,                # [L, I, H],  [L, 1, H]
    ln2g_ref, ln2b_ref,            # [L, 1, H]
    poolw_ref, poolb_ref,          # [H, H],     [1, H]
    clsw_ref, clsb_ref,            # [H, OUT_PAD], [1, OUT_PAD]
    out_ref,                       # [1, 1, OUT_PAD]
    *, layers, heads, head_dim, eps):
  H = heads * head_dim
  scale = 1.0 / (head_dim ** 0.5)

  def layer_norm(y, g, b):
    mean = jnp.mean(y, axis=-1, keepdims=True)
    cen = y - mean
    var = jnp.mean(cen * cen, axis=-1, keepdims=True)
    return cen * jax.lax.rsqrt(var + eps) * g + b

  # Embedding LayerNorm
  x = layer_norm(emb_ref[0], eg_ref[...], ebias_ref[...])          # [S, H]

  for l in range(layers):
    # ---- Self-attention (fused QKV, per-head lane slices) ----
    qkv = jnp.dot(x, wqkv_ref[l], preferred_element_type=jnp.float32) + bqkv_ref[l]
    q = qkv[:, 0 * H:1 * H]
    k = qkv[:, 1 * H:2 * H]
    v = qkv[:, 2 * H:3 * H]

    ctx_heads = []
    for h in range(heads):
      lo, hi = h * head_dim, (h + 1) * head_dim
      qh, kh, vh = q[:, lo:hi], k[:, lo:hi], v[:, lo:hi]
      s = jnp.dot(qh, kh.T, preferred_element_type=jnp.float32) * scale
      s = s - jnp.max(s, axis=-1, keepdims=True)
      p = jnp.exp(s)
      p = p * pl.reciprocal(jnp.sum(p, axis=-1, keepdims=True), approx=True)
      ctx_heads.append(jnp.dot(p, vh, preferred_element_type=jnp.float32))
    ctx = jnp.concatenate(ctx_heads, axis=-1)                       # [S, H]

    attn_out = jnp.dot(ctx, wo_ref[l], preferred_element_type=jnp.float32) + bo_ref[l]
    # fused residual + LayerNorm
    x = layer_norm(x + attn_out, ln1g_ref[l], ln1b_ref[l])

    # ---- Feed-forward ----
    ff = jnp.dot(x, w1_ref[l], preferred_element_type=jnp.float32) + b1_ref[l]
    # tanh-approx GELU (HF "gelu_new").
    # TODO(synk): switch to exact erf GELU if real bert-base-uncased weights are loaded.
    ff = 0.5 * ff * (1.0 + jnp.tanh(0.7978845608028654 * (ff + 0.044715 * ff * ff * ff)))
    ff = jnp.dot(ff, w2_ref[l], preferred_element_type=jnp.float32) + b2_ref[l]
    x = layer_norm(x + ff, ln2g_ref[l], ln2b_ref[l])

  # ---- Pooler: tanh(W * h_[CLS] + b)  == bert_output[1] ----
  cls_tok = x[0:1, :]                                               # [1, H]
  pooled = jnp.tanh(
      jnp.dot(cls_tok, poolw_ref[...], preferred_element_type=jnp.float32)
      + poolb_ref[...])

  # ---- Classification head (lane-padded to OUT_PAD) ----
  logits = jnp.dot(pooled, clsw_ref[...], preferred_element_type=jnp.float32) + clsb_ref[...]
  out_ref[0] = logits


# ----------------------------- Parameter setup ------------------------------

class Cfg:
  vocab_size = 64
  max_position = 16
  type_vocab = 2
  hidden = 32
  heads = 2
  head_dim = 16
  intermediate = 64
  layers = 2
  output_size = 49


def init_params(key, cfg):
  keys = iter(jax.random.split(key, 256))

  def nxt(shape):
    return (jax.random.normal(next(keys), shape) * 0.02).astype(jnp.float32)

  H, I, L = cfg.hidden, cfg.intermediate, cfg.layers
  zeros = lambda s: jnp.zeros(s, jnp.float32)
  ones = lambda s: jnp.ones(s, jnp.float32)

  wq = [nxt((H, H)) for _ in range(L)]
  wk = [nxt((H, H)) for _ in range(L)]
  wv = [nxt((H, H)) for _ in range(L)]
  wo = [nxt((H, H)) for _ in range(L)]
  w1 = [nxt((H, I)) for _ in range(L)]
  w2 = [nxt((I, H)) for _ in range(L)]

  cls_w = nxt((H, cfg.output_size))
  cls_w_pad = jnp.zeros((H, OUT_PAD), jnp.float32).at[:, :cfg.output_size].set(cls_w)
  cls_b_pad = jnp.zeros((1, OUT_PAD), jnp.float32)

  return {
      "word_emb": nxt((cfg.vocab_size, H)),
      "pos_emb": nxt((cfg.max_position, H)),
      "type_emb": nxt((cfg.type_vocab, H)),
      "emb_ln_g": ones((1, H)),
      "emb_ln_b": zeros((1, H)),
      # fused QKV weight per layer, stacked: [L, H, 3H]
      "wqkv": jnp.stack([jnp.concatenate([wq[l], wk[l], wv[l]], axis=1)
                         for l in range(L)]),
      "bqkv": zeros((L, 1, 3 * H)),
      "wo": jnp.stack(wo), "bo": zeros((L, 1, H)),
      "ln1_g": ones((L, 1, H)), "ln1_b": zeros((L, 1, H)),
      "w1": jnp.stack(w1), "b1": zeros((L, 1, I)),
      "w2": jnp.stack(w2), "b2": zeros((L, 1, H)),
      "ln2_g": ones((L, 1, H)), "ln2_b": zeros((L, 1, H)),
      "pool_w": nxt((H, H)),
      "pool_b": zeros((1, H)),
      "cls_w_pad": cls_w_pad,
      "cls_b_pad": cls_b_pad,
  }


# ----------------------------- Forward pass ---------------------------------

def bert_classifier_forward(params, input_ids, cfg):
  B, S = input_ids.shape
  H, I, L = cfg.hidden, cfg.intermediate, cfg.layers

  # Embedding lookups (gather) stay in plain JAX glue; everything else is fused.
  emb = (params["word_emb"][input_ids]
         + params["pos_emb"][:S][None, :, :]
         + params["type_emb"][0][None, None, :]).astype(jnp.float32)   # [B, S, H]

  def full(shape):
    n = len(shape)
    return pl.BlockSpec(shape, lambda b, _n=n: (0,) * _n)

  kernel = functools.partial(
      _bert_fused_kernel,
      layers=L, heads=cfg.heads, head_dim=cfg.head_dim, eps=1e-12)

  out = pl.pallas_call(
      kernel,
      out_shape=jax.ShapeDtypeStruct((B, 1, OUT_PAD), jnp.float32),
      grid=(B,),
      in_specs=[
          pl.BlockSpec((1, S, H), lambda b: (b, 0, 0)),   # per-batch embeddings
          full((1, H)), full((1, H)),                     # emb LN
          full((L, H, 3 * H)), full((L, 1, 3 * H)),       # fused QKV
          full((L, H, H)), full((L, 1, H)),               # attn output proj
          full((L, 1, H)), full((L, 1, H)),               # LN1
          full((L, H, I)), full((L, 1, I)),               # FFN in
          full((L, I, H)), full((L, 1, H)),               # FFN out
          full((L, 1, H)), full((L, 1, H)),               # LN2
          full((H, H)), full((1, H)),                     # pooler
          full((H, OUT_PAD)), full((1, OUT_PAD)),         # classifier (lane-padded)
      ],
      out_specs=pl.BlockSpec((1, 1, OUT_PAD), lambda b: (b, 0, 0)),
      compiler_params=pltpu.CompilerParams(
          dimension_semantics=("parallel",)),             # shard batch over v7x's 2 TCs
  )(
      emb,
      params["emb_ln_g"], params["emb_ln_b"],
      params["wqkv"], params["bqkv"],
      params["wo"], params["bo"],
      params["ln1_g"], params["ln1_b"],
      params["w1"], params["b1"],
      params["w2"], params["b2"],
      params["ln2_g"], params["ln2_b"],
      params["pool_w"], params["pool_b"],
      params["cls_w_pad"], params["cls_b_pad"],
  )
  # Slice the lane-padded classifier output back to output_size.
  return out.reshape(B, OUT_PAD)[:, :cfg.output_size]


# --------------------------------- Main --------------------------------------

if __name__ == "__main__":
  cfg = Cfg()
  B, S = 2, 8

  key = jax.random.PRNGKey(0)
  k_params, k_ids = jax.random.split(key)
  params = init_params(k_params, cfg)
  input_ids = jax.random.randint(k_ids, (B, S), 0, cfg.vocab_size, dtype=jnp.int32)

  fwd = jax.jit(lambda p, ids: bert_classifier_forward(p, ids, cfg))
  logits = jax.block_until_ready(fwd(params, input_ids))

  assert logits.shape == (B, cfg.output_size), logits.shape
  assert logits.dtype == jnp.float32
  assert bool(jnp.all(jnp.isfinite(logits)))
  print("KERNEL_OK")
</pallas_src>

<mosaic_0001>
module attributes {stable_mosaic.version = 11 : i64} {
  func.func @_bert_fused_kernel(%arg0: i32, %arg1: memref<1x8x32xf32, #tpu.memory_space<vmem>>, %arg2: memref<1x32xf32, #tpu.memory_space<vmem>>, %arg3: memref<1x32xf32, #tpu.memory_space<vmem>>, %arg4: memref<2x32x96xf32, #tpu.memory_space<vmem>>, %arg5: memref<2x1x96xf32, #tpu.memory_space<vmem>>, %arg6: memref<2x32x32xf32, #tpu.memory_space<vmem>>, %arg7: memref<2x1x32xf32, #tpu.memory_space<vmem>>, %arg8: memref<2x1x32xf32, #tpu.memory_space<vmem>>, %arg9: memref<2x1x32xf32, #tpu.memory_space<vmem>>, %arg10: memref<2x32x64xf32, #tpu.memory_space<vmem>>, %arg11: memref<2x1x64xf32, #tpu.memory_space<vmem>>, %arg12: memref<2x64x32xf32, #tpu.memory_space<vmem>>, %arg13: memref<2x1x32xf32, #tpu.memory_space<vmem>>, %arg14: memref<2x1x32xf32, #tpu.memory_space<vmem>>, %arg15: memref<2x1x32xf32, #tpu.memory_space<vmem>>, %arg16: memref<32x32xf32, #tpu.memory_space<vmem>>, %arg17: memref<1x32xf32, #tpu.memory_space<vmem>>, %arg18: memref<32x128xf32, #tpu.memory_space<vmem>>, %arg19: memref<1x128xf32, #tpu.memory_space<vmem>>, %arg20: memref<1x1x128xf32, #tpu.memory_space<vmem>>) attributes {dimension_semantics = [#tpu.dimension_semantics<parallel>], iteration_bounds = array<i64: 2>, scalar_prefetch = 0 : i64, scratch_operands = 0 : i64, tpu.core_type = #tpu.core_type<tc>, window_params = [{transform_indices = @transform_0, window_bounds = array<i64: 1, 8, 32>}, {pipeline_mode = #tpu.pipeline_mode<synchronous>, transform_indices = @transform_1, window_bounds = array<i64: 1, 32>}, {pipeline_mode = #tpu.pipeline_mode<synchronous>, transform_indices = @transform_2, window_bounds = array<i64: 1, 32>}, {pipeline_mode = #tpu.pipeline_mode<synchronous>, transform_indices = @transform_3, window_bounds = array<i64: 2, 32, 96>}, {pipeline_mode = #tpu.pipeline_mode<synchronous>, transform_indices = @transform_4, window_bounds = array<i64: 2, 1, 96>}, {pipeline_mode = #tpu.pipeline_mode<synchronous>, transform_indices = @transform_5, window_bounds = array<i64: 2, 32, 32>}, {pipeline_mode = #tpu.pipeline_mode<synchronous>, transform_indices = @transform_6, window_bounds = array<i64: 2, 1, 32>}, {pipeline_mode = #tpu.pipeline_mode<synchronous>, transform_indices = @transform_7, window_bounds = array<i64: 2, 1, 32>}, {pipeline_mode = #tpu.pipeline_mode<synchronous>, transform_indices = @transform_8, window_bounds = array<i64: 2, 1, 32>}, {pipeline_mode = #tpu.pipeline_mode<synchronous>, transform_indices = @transform_9, window_bounds = array<i64: 2, 32, 64>}, {pipeline_mode = #tpu.pipeline_mode<synchronous>, transform_indices = @transform_10, window_bounds = array<i64: 2, 1, 64>}, {pipeline_mode = #tpu.pipeline_mode<synchronous>, transform_indices = @transform_11, window_bounds = array<i64: 2, 64, 32>}, {pipeline_mode = #tpu.pipeline_mode<synchronous>, transform_indices = @transform_12, window_bounds = array<i64: 2, 1, 32>}, {pipeline_mode = #tpu.pipeline_mode<synchronous>, transform_indices = @transform_13, window_bounds = array<i64: 2, 1, 32>}, {pipeline_mode = #tpu.pipeline_mode<synchronous>, transform_indices = @transform_14, window_bounds = array<i64: 2, 1, 32>}, {pipeline_mode = #tpu.pipeline_mode<synchronous>, transform_indices = @transform_15, window_bounds = array<i64: 32, 32>}, {pipeline_mode = #tpu.pipeline_mode<synchronous>, transform_indices = @transform_16, window_bounds = array<i64: 1, 32>}, {pipeline_mode = #tpu.pipeline_mode<synchronous>, transform_indices = @transform_17, window_bounds = array<i64: 32, 128>}, {pipeline_mode = #tpu.pipeline_mode<synchronous>, transform_indices = @transform_18, window_bounds = array<i64: 1, 128>}, {transform_indices = @transform_19, window_bounds = array<i64: 1, 1, 128>}]} {
    %c0 = arith.constant 0 : index
    %c0_0 = arith.constant 0 : index
    %c0_1 = arith.constant 0 : index
    %0 = vector.load %arg1[%c0, %c0_0, %c0_1] : memref<1x8x32xf32, #tpu.memory_space<vmem>>, vector<1x8x32xf32>
    %1 = vector.shape_cast %0 : vector<1x8x32xf32> to vector<8x32xf32>
    %c0_2 = arith.constant 0 : index
    %c0_3 = arith.constant 0 : index
    %2 = vector.load %arg2[%c0_2, %c0_3] : memref<1x32xf32, #tpu.memory_space<vmem>>, vector<1x32xf32>
    %c0_4 = arith.constant 0 : index
    %c0_5 = arith.constant 0 : index
    %3 = vector.load %arg3[%c0_4, %c0_5] : memref<1x32xf32, #tpu.memory_space<vmem>>, vector<1x32xf32>
    %cst = arith.constant dense<0.000000e+00> : vector<8xf32>
    %4 = vector.multi_reduction <add>, %1, %cst [1] : vector<8x32xf32> to vector<8xf32>
    %5 = vector.shape_cast %4 : vector<8xf32> to vector<8x1xf32>
    %cst_6 = arith.constant 3.200000e+01 : f32
    %6 = vector.broadcast %cst_6 : f32 to vector<8x1xf32>
    %7 = arith.divf %5, %6 : vector<8x1xf32>
    %8 = vector.broadcast %7 : vector<8x1xf32> to vector<8x32xf32>
    %9 = arith.subf %1, %8 : vector<8x32xf32>
    %10 = arith.mulf %9, %9 : vector<8x32xf32>
    %cst_7 = arith.constant dense<0.000000e+00> : vector<8xf32>
    %11 = vector.multi_reduction <add>, %10, %cst_7 [1] : vector<8x32xf32> to vector<8xf32>
    %12 = vector.shape_cast %11 : vector<8xf32> to vector<8x1xf32>
    %cst_8 = arith.constant 3.200000e+01 : f32
    %13 = vector.broadcast %cst_8 : f32 to vector<8x1xf32>
    %14 = arith.divf %12, %13 : vector<8x1xf32>
    %cst_9 = arith.constant 9.99999996E-13 : f32
    %15 = vector.broadcast %cst_9 : f32 to vector<8x1xf32>
    %16 = arith.addf %14, %15 : vector<8x1xf32>
    %17 = math.rsqrt %16 : vector<8x1xf32>
    %18 = vector.broadcast %17 : vector<8x1xf32> to vector<8x32xf32>
    %19 = arith.mulf %9, %18 : vector<8x32xf32>
    %20 = vector.broadcast %2 : vector<1x32xf32> to vector<8x32xf32>
    %21 = arith.mulf %19, %20 : vector<8x32xf32>
    %22 = vector.broadcast %3 : vector<1x32xf32> to vector<8x32xf32>
    %23 = arith.addf %21, %22 : vector<8x32xf32>
    %c0_10 = arith.constant 0 : index
    %c0_11 = arith.constant 0 : index
    %c0_12 = arith.constant 0 : index
    %24 = vector.load %arg4[%c0_10, %c0_11, %c0_12] : memref<2x32x96xf32, #tpu.memory_space<vmem>>, vector<1x32x96xf32>
    %25 = vector.shape_cast %24 : vector<1x32x96xf32> to vector<32x96xf32>
    %cst_13 = arith.constant dense<0.000000e+00> : vector<8x96xf32>
    %26 = tpu.matmul %23, %25, %cst_13 {dimension_numbers = #tpu.dot_dimension_numbers<[1], [0], [0], [1], [0, 0, 1, 1], [], []>} : vector<8x32xf32>, vector<32x96xf32>, vector<8x96xf32> -> vector<8x96xf32>
    %c0_14 = arith.constant 0 : index
    %c0_15 = arith.constant 0 : index
    %c0_16 = arith.constant 0 : index
    %27 = vector.load %arg5[%c0_14, %c0_15, %c0_16] : memref<2x1x96xf32, #tpu.memory_space<vmem>>, vector<1x1x96xf32>
    %28 = vector.shape_cast %27 : vector<1x1x96xf32> to vector<1x96xf32>
    %29 = vector.broadcast %28 : vector<1x96xf32> to vector<8x96xf32>
    %30 = arith.addf %26, %29 : vector<8x96xf32>
    %31 = vector.extract_strided_slice %30 {offsets = [0, 0], sizes = [8, 32], strides = [1, 1]} : vector<8x96xf32> to vector<8x32xf32>
    %32 = vector.extract_strided_slice %30 {offsets = [0, 32], sizes = [8, 32], strides = [1, 1]} : vector<8x96xf32> to vector<8x32xf32>
    %33 = vector.extract_strided_slice %30 {offsets = [0, 64], sizes = [8, 32], strides = [1, 1]} : vector<8x96xf32> to vector<8x32xf32>
    %34 = vector.extract_strided_slice %31 {offsets = [0, 0], sizes = [8, 16], strides = [1, 1]} : vector<8x32xf32> to vector<8x16xf32>
    %35 = vector.extract_strided_slice %32 {offsets = [0, 0], sizes = [8, 16], strides = [1, 1]} : vector<8x32xf32> to vector<8x16xf32>
    %36 = vector.extract_strided_slice %33 {offsets = [0, 0], sizes = [8, 16], strides = [1, 1]} : vector<8x32xf32> to vector<8x16xf32>
    %37 = tpu.transpose %35, [1, 0] : vector<8x16xf32> -> vector<16x8xf32>
    %cst_17 = arith.constant dense<0.000000e+00> : vector<8x8xf32>
    %38 = tpu.matmul %34, %37, %cst_17 {dimension_numbers = #tpu.dot_dimension_numbers<[1], [0], [0], [1], [0, 0, 1, 1], [], []>} : vector<8x16xf32>, vector<16x8xf32>, vector<8x8xf32> -> vector<8x8xf32>
    %cst_18 = arith.constant 2.500000e-01 : f32
    %39 = vector.broadcast %cst_18 : f32 to vector<8x8xf32>
    %40 = arith.mulf %38, %39 : vector<8x8xf32>
    %cst_19 = arith.constant dense<0xFF800000> : vector<8xf32>
    %41 = vector.multi_reduction <maximumf>, %40, %cst_19 [1] : vector<8x8xf32> to vector<8xf32>
    %42 = vector.shape_cast %41 : vector<8xf32> to vector<8x1xf32>
    %43 = vector.broadcast %42 : vector<8x1xf32> to vector<8x8xf32>
    %44 = arith.subf %40, %43 : vector<8x8xf32>
    %45 = math.exp %44 : vector<8x8xf32>
    %cst_20 = arith.constant dense<0.000000e+00> : vector<8xf32>
    %46 = vector.multi_reduction <add>, %45, %cst_20 [1] : vector<8x8xf32> to vector<8xf32>
    %47 = vector.shape_cast %46 : vector<8xf32> to vector<8x1xf32>
    %48 = tpu.reciprocal %47 {approx = true} : vector<8x1xf32> -> vector<8x1xf32>
    %49 = vector.broadcast %48 : vector<8x1xf32> to vector<8x8xf32>
    %50 = arith.mulf %45, %49 : vector<8x8xf32>
    %cst_21 = arith.constant dense<0.000000e+00> : vector<8x16xf32>
    %51 = tpu.matmul %50, %36, %cst_21 {dimension_numbers = #tpu.dot_dimension_numbers<[1], [0], [0], [1], [0, 0, 1, 1], [], []>} : vector<8x8xf32>, vector<8x16xf32>, vector<8x16xf32> -> vector<8x16xf32>
    %52 = vector.extract_strided_slice %31 {offsets = [0, 16], sizes = [8, 16], strides = [1, 1]} : vector<8x32xf32> to vector<8x16xf32>
    %53 = vector.extract_strided_slice %32 {offsets = [0, 16], sizes = [8, 16], strides = [1, 1]} : vector<8x32xf32> to vector<8x16xf32>
    %54 = vector.extract_strided_slice %33 {offsets = [0, 16], sizes = [8, 16], strides = [1, 1]} : vector<8x32xf32> to vector<8x16xf32>
    %55 = tpu.transpose %53, [1, 0] : vector<8x16xf32> -> vector<16x8xf32>
    %cst_22 = arith.constant dense<0.000000e+00> : vector<8x8xf32>
    %56 = tpu.matmul %52, %55, %cst_22 {dimension_numbers = #tpu.dot_dimension_numbers<[1], [0], [0], [1], [0, 0, 1, 1], [], []>} : vector<8x16xf32>, vector<16x8xf32>, vector<8x8xf32> -> vector<8x8xf32>
    %cst_23 = arith.constant 2.500000e-01 : f32
    %57 = vector.broadcast %cst_23 : f32 to vector<8x8xf32>
    %58 = arith.mulf %56, %57 : vector<8x8xf32>
    %cst_24 = arith.constant dense<0xFF800000> : vector<8xf32>
    %59 = vector.multi_reduction <maximumf>, %58, %cst_24 [1] : vector<8x8xf32> to vector<8xf32>
    %60 = vector.shape_cast %59 : vector<8xf32> to vector<8x1xf32>
    %61 = vector.broadcast %60 : vector<8x1xf32> to vector<8x8xf32>
    %62 = arith.subf %58, %61 : vector<8x8xf32>
    %63 = math.exp %62 : vector<8x8xf32>
    %cst_25 = arith.constant dense<0.000000e+00> : vector<8xf32>
    %64 = vector.multi_reduction <add>, %63, %cst_25 [1] : vector<8x8xf32> to vector<8xf32>
    %65 = vector.shape_cast %64 : vector<8xf32> to vector<8x1xf32>
    %66 = tpu.reciprocal %65 {approx = true} : vector<8x1xf32> -> vector<8x1xf32>
    %67 = vector.broadcast %66 : vector<8x1xf32> to vector<8x8xf32>
    %68 = arith.mulf %63, %67 : vector<8x8xf32>
    %cst_26 = arith.constant dense<0.000000e+00> : vector<8x16xf32>
    %69 = tpu.matmul %68, %54, %cst_26 {dimension_numbers = #tpu.dot_dimension_numbers<[1], [0], [0], [1], [0, 0, 1, 1], [], []>} : vector<8x8xf32>, vector<8x16xf32>, vector<8x16xf32> -> vector<8x16xf32>
    %70 = tpu.concatenate %51, %69 in 1 : vector<8x16xf32>, vector<8x16xf32> -> vector<8x32xf32>
    %c0_27 = arith.constant 0 : index
    %c0_28 = arith.constant 0 : index
    %c0_29 = arith.constant 0 : index
    %71 = vector.load %arg6[%c0_27, %c0_28, %c0_29] : memref<2x32x32xf32, #tpu.memory_space<vmem>>, vector<1x32x32xf32>
    %72 = vector.shape_cast %71 : vector<1x32x32xf32> to vector<32x32xf32>
    %cst_30 = arith.constant dense<0.000000e+00> : vector<8x32xf32>
    %73 = tpu.matmul %70, %72, %cst_30 {dimension_numbers = #tpu.dot_dimension_numbers<[1], [0], [0], [1], [0, 0, 1, 1], [], []>} : vector<8x32xf32>, vector<32x32xf32>, vector<8x32xf32> -> vector<8x32xf32>
    %c0_31 = arith.constant 0 : index
    %c0_32 = arith.constant 0 : index
    %c0_33 = arith.constant 0 : index
    %74 = vector.load %arg7[%c0_31, %c0_32, %c0_33] : memref<2x1x32xf32, #tpu.memory_space<vmem>>, vector<1x1x32xf32>
    %75 = vector.shape_cast %74 : vector<1x1x32xf32> to vector<1x32xf32>
    %76 = vector.broadcast %75 : vector<1x32xf32> to vector<8x32xf32>
    %77 = arith.addf %73, %76 : vector<8x32xf32>
    %78 = arith.addf %23, %77 : vector<8x32xf32>
    %c0_34 = arith.constant 0 : index
    %c0_35 = arith.constant 0 : index
    %c0_36 = arith.constant 0 : index
    %79 = vector.load %arg8[%c0_34, %c0_35, %c0_36] : memref<2x1x32xf32, #tpu.memory_space<vmem>>, vector<1x1x32xf32>
    %80 = vector.shape_cast %79 : vector<1x1x32xf32> to vector<1x32xf32>
    %c0_37 = arith.constant 0 : index
    %c0_38 = arith.constant 0 : index
    %c0_39 = arith.constant 0 : index
    %81 = vector.load %arg9[%c0_37, %c0_38, %c0_39] : memref<2x1x32xf32, #tpu.memory_space<vmem>>, vector<1x1x32xf32>
    %82 = vector.shape_cast %81 : vector<1x1x32xf32> to vector<1x32xf32>
    %cst_40 = arith.constant dense<0.000000e+00> : vector<8xf32>
    %83 = vector.multi_reduction <add>, %78, %cst_40 [1] : vector<8x32xf32> to vector<8xf32>
    %84 = vector.shape_cast %83 : vector<8xf32> to vector<8x1xf32>
    %cst_41 = arith.constant 3.200000e+01 : f32
    %85 = vector.broadcast %cst_41 : f32 to vector<8x1xf32>
    %86 = arith.divf %84, %85 : vector<8x1xf32>
    %87 = vector.broadcast %86 : vector<8x1xf32> to vector<8x32xf32>
    %88 = arith.subf %78, %87 : vector<8x32xf32>
    %89 = arith.mulf %88, %88 : vector<8x32xf32>
    %cst_42 = arith.constant dense<0.000000e+00> : vector<8xf32>
    %90 = vector.multi_reduction <add>, %89, %cst_42 [1] : vector<8x32xf32> to vector<8xf32>
    %91 = vector.shape_cast %90 : vector<8xf32> to vector<8x1xf32>
    %cst_43 = arith.constant 3.200000e+01 : f32
    %92 = vector.broadcast %cst_43 : f32 to vector<8x1xf32>
    %93 = arith.divf %91, %92 : vector<8x1xf32>
    %cst_44 = arith.constant 9.99999996E-13 : f32
    %94 = vector.broadcast %cst_44 : f32 to vector<8x1xf32>
    %95 = arith.addf %93, %94 : vector<8x1xf32>
    %96 = math.rsqrt %95 : vector<8x1xf32>
    %97 = vector.broadcast %96 : vector<8x1xf32> to vector<8x32xf32>
    %98 = arith.mulf %88, %97 : vector<8x32xf32>
    %99 = vector.broadcast %80 : vector<1x32xf32> to vector<8x32xf32>
    %100 = arith.mulf %98, %99 : vector<8x32xf32>
    %101 = vector.broadcast %82 : vector<1x32xf32> to vector<8x32xf32>
    %102 = arith.addf %100, %101 : vector<8x32xf32>
    %c0_45 = arith.constant 0 : index
    %c0_46 = arith.constant 0 : index
    %c0_47 = arith.constant 0 : index
    %103 = vector.load %arg10[%c0_45, %c0_46, %c0_47] : memref<2x32x64xf32, #tpu.memory_space<vmem>>, vector<1x32x64xf32>
    %104 = vector.shape_cast %103 : vector<1x32x64xf32> to vector<32x64xf32>
    %cst_48 = arith.constant dense<0.000000e+00> : vector<8x64xf32>
    %105 = tpu.matmul %102, %104, %cst_48 {dimension_numbers = #tpu.dot_dimension_numbers<[1], [0], [0], [1], [0, 0, 1, 1], [], []>} : vector<8x32xf32>, vector<32x64xf32>, vector<8x64xf32> -> vector<8x64xf32>
    %c0_49 = arith.constant 0 : index
    %c0_50 = arith.constant 0 : index
    %c0_51 = arith.constant 0 : index
    %106 = vector.load %arg11[%c0_49, %c0_50, %c0_51] : memref<2x1x64xf32, #tpu.memory_space<vmem>>, vector<1x1x64xf32>
    %107 = vector.shape_cast %106 : vector<1x1x64xf32> to vector<1x64xf32>
    %108 = vector.broadcast %107 : vector<1x64xf32> to vector<8x64xf32>
    %109 = arith.addf %105, %108 : vector<8x64xf32>
    %cst_52 = arith.constant 5.000000e-01 : f32
    %110 = vector.broadcast %cst_52 : f32 to vector<8x64xf32>
    %111 = arith.mulf %110, %109 : vector<8x64xf32>
    %cst_53 = arith.constant 4.471500e-02 : f32
    %112 = vector.broadcast %cst_53 : f32 to vector<8x64xf32>
    %113 = arith.mulf %112, %109 : vector<8x64xf32>
    %114 = arith.mulf %113, %109 : vector<8x64xf32>
    %115 = arith.mulf %114, %109 : vector<8x64xf32>
    %116 = arith.addf %109, %115 : vector<8x64xf32>
    %cst_54 = arith.constant 0.797884583 : f32
    %117 = vector.broadcast %cst_54 : f32 to vector<8x64xf32>
    %118 = arith.mulf %117, %116 : vector<8x64xf32>
    %119 = math.tanh %118 : vector<8x64xf32>
    %cst_55 = arith.constant 1.000000e+00 : f32
    %120 = vector.broadcast %cst_55 : f32 to vector<8x64xf32>
    %121 = arith.addf %120, %119 : vector<8x64xf32>
    %122 = arith.mulf %111, %121 : vector<8x64xf32>
    %c0_56 = arith.constant 0 : index
    %c0_57 = arith.constant 0 : index
    %c0_58 = arith.constant 0 : index
    %123 = vector.load %arg12[%c0_56, %c0_57, %c0_58] : memref<2x64x32xf32, #tpu.memory_space<vmem>>, vector<1x64x32xf32>
    %124 = vector.shape_cast %123 : vector<1x64x32xf32> to vector<64x32xf32>
    %cst_59 = arith.constant dense<0.000000e+00> : vector<8x32xf32>
    %125 = tpu.matmul %122, %124, %cst_59 {dimension_numbers = #tpu.dot_dimension_numbers<[1], [0], [0], [1], [0, 0, 1, 1], [], []>} : vector<8x64xf32>, vector<64x32xf32>, vector<8x32xf32> -> vector<8x32xf32>
    %c0_60 = arith.constant 0 : index
    %c0_61 = arith.constant 0 : index
    %c0_62 = arith.constant 0 : index
    %126 = vector.load %arg13[%c0_60, %c0_61, %c0_62] : memref<2x1x32xf32, #tpu.memory_space<vmem>>, vector<1x1x32xf32>
    %127 = vector.shape_cast %126 : vector<1x1x32xf32> to vector<1x32xf32>
    %128 = vector.broadcast %127 : vector<1x32xf32> to vector<8x32xf32>
    %129 = arith.addf %125, %128 : vector<8x32xf32>
    %130 = arith.addf %102, %129 : vector<8x32xf32>
    %c0_63 = arith.constant 0 : index
    %c0_64 = arith.constant 0 : index
    %c0_65 = arith.constant 0 : index
    %131 = vector.load %arg14[%c0_63, %c0_64, %c0_65] : memref<2x1x32xf32, #tpu.memory_space<vmem>>, vector<1x1x32xf32>
    %132 = vector.shape_cast %131 : vector<1x1x32xf32> to vector<1x32xf32>
    %c0_66 = arith.constant 0 : index
    %c0_67 = arith.constant 0 : index
    %c0_68 = arith.constant 0 : index
    %133 = vector.load %arg15[%c0_66, %c0_67, %c0_68] : memref<2x1x32xf32, #tpu.memory_space<vmem>>, vector<1x1x32xf32>
    %134 = vector.shape_cast %133 : vector<1x1x32xf32> to vector<1x32xf32>
    %cst_69 = arith.constant dense<0.000000e+00> : vector<8xf32>
    %135 = vector.multi_reduction <add>, %130, %cst_69 [1] : vector<8x32xf32> to vector<8xf32>
    %136 = vector.shape_cast %135 : vector<8xf32> to vector<8x1xf32>
    %cst_70 = arith.constant 3.200000e+01 : f32
    %137 = vector.broadcast %cst_70 : f32 to vector<8x1xf32>
    %138 = arith.divf %136, %137 : vector<8x1xf32>
    %139 = vector.broadcast %138 : vector<8x1xf32> to vector<8x32xf32>
    %140 = arith.subf %130, %139 : vector<8x32xf32>
    %141 = arith.mulf %140, %140 : vector<8x32xf32>
    %cst_71 = arith.constant dense<0.000000e+00> : vector<8xf32>
    %142 = vector.multi_reduction <add>, %141, %cst_71 [1] : vector<8x32xf32> to vector<8xf32>
    %143 = vector.shape_cast %142 : vector<8xf32> to vector<8x1xf32>
    %cst_72 = arith.constant 3.200000e+01 : f32
    %144 = vector.broadcast %cst_72 : f32 to vector<8x1xf32>
    %145 = arith.divf %143, %144 : vector<8x1xf32>
    %cst_73 = arith.constant 9.99999996E-13 : f32
    %146 = vector.broadcast %cst_73 : f32 to vector<8x1xf32>
    %147 = arith.addf %145, %146 : vector<8x1xf32>
    %148 = math.rsqrt %147 : vector<8x1xf32>
    %149 = vector.broadcast %148 : vector<8x1xf32> to vector<8x32xf32>
    %150 = arith.mulf %140, %149 : vector<8x32xf32>
    %151 = vector.broadcast %132 : vector<1x32xf32> to vector<8x32xf32>
    %152 = arith.mulf %150, %151 : vector<8x32xf32>
    %153 = vector.broadcast %134 : vector<1x32xf32> to vector<8x32xf32>
    %154 = arith.addf %152, %153 : vector<8x32xf32>
    %c1 = arith.constant 1 : index
    %c0_74 = arith.constant 0 : index
    %c0_75 = arith.constant 0 : index
    %155 = vector.load %arg4[%c1, %c0_74, %c0_75] : memref<2x32x96xf32, #tpu.memory_space<vmem>>, vector<1x32x96xf32>
    %156 = vector.shape_cast %155 : vector<1x32x96xf32> to vector<32x96xf32>
    %cst_76 = arith.constant dense<0.000000e+00> : vector<8x96xf32>
    %157 = tpu.matmul %154, %156, %cst_76 {dimension_numbers = #tpu.dot_dimension_numbers<[1], [0], [0], [1], [0, 0, 1, 1], [], []>} : vector<8x32xf32>, vector<32x96xf32>, vector<8x96xf32> -> vector<8x96xf32>
    %c1_77 = arith.constant 1 : index
    %c0_78 = arith.constant 0 : index
    %c0_79 = arith.constant 0 : index
    %158 = vector.load %arg5[%c1_77, %c0_78, %c0_79] : memref<2x1x96xf32, #tpu.memory_space<vmem>>, vector<1x1x96xf32>
    %159 = vector.shape_cast %158 : vector<1x1x96xf32> to vector<1x96xf32>
    %160 = vector.broadcast %159 : vector<1x96xf32> to vector<8x96xf32>
    %161 = arith.addf %157, %160 : vector<8x96xf32>
    %162 = vector.extract_strided_slice %161 {offsets = [0, 0], sizes = [8, 32], strides = [1, 1]} : vector<8x96xf32> to vector<8x32xf32>
    %163 = vector.extract_strided_slice %161 {offsets = [0, 32], sizes = [8, 32], strides = [1, 1]} : vector<8x96xf32> to vector<8x32xf32>
    %164 = vector.extract_strided_slice %161 {offsets = [0, 64], sizes = [8, 32], strides = [1, 1]} : vector<8x96xf32> to vector<8x32xf32>
    %165 = vector.extract_strided_slice %162 {offsets = [0, 0], sizes = [8, 16], strides = [1, 1]} : vector<8x32xf32> to vector<8x16xf32>
    %166 = vector.extract_strided_slice %163 {offsets = [0, 0], sizes = [8, 16], strides = [1, 1]} : vector<8x32xf32> to vector<8x16xf32>
    %167 = vector.extract_strided_slice %164 {offsets = [0, 0], sizes = [8, 16], strides = [1, 1]} : vector<8x32xf32> to vector<8x16xf32>
    %168 = tpu.transpose %166, [1, 0] : vector<8x16xf32> -> vector<16x8xf32>
    %cst_80 = arith.constant dense<0.000000e+00> : vector<8x8xf32>
    %169 = tpu.matmul %165, %168, %cst_80 {dimension_numbers = #tpu.dot_dimension_numbers<[1], [0], [0], [1], [0, 0, 1, 1], [], []>} : vector<8x16xf32>, vector<16x8xf32>, vector<8x8xf32> -> vector<8x8xf32>
    %cst_81 = arith.constant 2.500000e-01 : f32
    %170 = vector.broadcast %cst_81 : f32 to vector<8x8xf32>
    %171 = arith.mulf %169, %170 : vector<8x8xf32>
    %cst_82 = arith.constant dense<0xFF800000> : vector<8xf32>
    %172 = vector.multi_reduction <maximumf>, %171, %cst_82 [1] : vector<8x8xf32> to vector<8xf32>
    %173 = vector.shape_cast %172 : vector<8xf32> to vector<8x1xf32>
    %174 = vector.broadcast %173 : vector<8x1xf32> to vector<8x8xf32>
    %175 = arith.subf %171, %174 : vector<8x8xf32>
    %176 = math.exp %175 : vector<8x8xf32>
    %cst_83 = arith.constant dense<0.000000e+00> : vector<8xf32>
    %177 = vector.multi_reduction <add>, %176, %cst_83 [1] : vector<8x8xf32> to vector<8xf32>
    %178 = vector.shape_cast %177 : vector<8xf32> to vector<8x1xf32>
    %179 = tpu.reciprocal %178 {approx = true} : vector<8x1xf32> -> vector<8x1xf32>
    %180 = vector.broadcast %179 : vector<8x1xf32> to vector<8x8xf32>
    %181 = arith.mulf %176, %180 : vector<8x8xf32>
    %cst_84 = arith.constant dense<0.000000e+00> : vector<8x16xf32>
    %182 = tpu.matmul %181, %167, %cst_84 {dimension_numbers = #tpu.dot_dimension_numbers<[1], [0], [0], [1], [0, 0, 1, 1], [], []>} : vector<8x8xf32>, vector<8x16xf32>, vector<8x16xf32> -> vector<8x16xf32>
    %183 = vector.extract_strided_slice %162 {offsets = [0, 16], sizes = [8, 16], strides = [1, 1]} : vector<8x32xf32> to vector<8x16xf32>
    %184 = vector.extract_strided_slice %163 {offsets = [0, 16], sizes = [8, 16], strides = [1, 1]} : vector<8x32xf32> to vector<8x16xf32>
    %185 = vector.extract_strided_slice %164 {offsets = [0, 16], sizes = [8, 16], strides = [1, 1]} : vector<8x32xf32> to vector<8x16xf32>
    %186 = tpu.transpose %184, [1, 0] : vector<8x16xf32> -> vector<16x8xf32>
    %cst_85 = arith.constant dense<0.000000e+00> : vector<8x8xf32>
    %187 = tpu.matmul %183, %186, %cst_85 {dimension_numbers = #tpu.dot_dimension_numbers<[1], [0], [0], [1], [0, 0, 1, 1], [], []>} : vector<8x16xf32>, vector<16x8xf32>, vector<8x8xf32> -> vector<8x8xf32>
    %cst_86 = arith.constant 2.500000e-01 : f32
    %188 = vector.broadcast %cst_86 : f32 to vector<8x8xf32>
    %189 = arith.mulf %187, %188 : vector<8x8xf32>
    %cst_87 = arith.constant dense<0xFF800000> : vector<8xf32>
    %190 = vector.multi_reduction <maximumf>, %189, %cst_87 [1] : vector<8x8xf32> to vector<8xf32>
    %191 = vector.shape_cast %190 : vector<8xf32> to vector<8x1xf32>
    %192 = vector.broadcast %191 : vector<8x1xf32> to vector<8x8xf32>
    %193 = arith.subf %189, %192 : vector<8x8xf32>
    %194 = math.exp %193 : vector<8x8xf32>
    %cst_88 = arith.constant dense<0.000000e+00> : vector<8xf32>
    %195 = vector.multi_reduction <add>, %194, %cst_88 [1] : vector<8x8xf32> to vector<8xf32>
    %196 = vector.shape_cast %195 : vector<8xf32> to vector<8x1xf32>
    %197 = tpu.reciprocal %196 {approx = true} : vector<8x1xf32> -> vector<8x1xf32>
    %198 = vector.broadcast %197 : vector<8x1xf32> to vector<8x8xf32>
    %199 = arith.mulf %194, %198 : vector<8x8xf32>
    %cst_89 = arith.constant dense<0.000000e+00> : vector<8x16xf32>
    %200 = tpu.matmul %199, %185, %cst_89 {dimension_numbers = #tpu.dot_dimension_numbers<[1], [0], [0], [1], [0, 0, 1, 1], [], []>} : vector<8x8xf32>, vector<8x16xf32>, vector<8x16xf32> -> vector<8x16xf32>
    %201 = tpu.concatenate %182, %200 in 1 : vector<8x16xf32>, vector<8x16xf32> -> vector<8x32xf32>
    %c1_90 = arith.constant 1 : index
    %c0_91 = arith.constant 0 : index
    %c0_92 = arith.constant 0 : index
    %202 = vector.load %arg6[%c1_90, %c0_91, %c0_92] : memref<2x32x32xf32, #tpu.memory_space<vmem>>, vector<1x32x32xf32>
    %203 = vector.shape_cast %202 : vector<1x32x32xf32> to vector<32x32xf32>
    %cst_93 = arith.constant dense<0.000000e+00> : vector<8x32xf32>
    %204 = tpu.matmul %201, %203, %cst_93 {dimension_numbers = #tpu.dot_dimension_numbers<[1], [0], [0], [1], [0, 0, 1, 1], [], []>} : vector<8x32xf32>, vector<32x32xf32>, vector<8x32xf32> -> vector<8x32xf32>
    %c1_94 = arith.constant 1 : index
    %c0_95 = arith.constant 0 : index
    %c0_96 = arith.constant 0 : index
    %205 = vector.load %arg7[%c1_94, %c0_95, %c0_96] : memref<2x1x32xf32, #tpu.memory_space<vmem>>, vector<1x1x32xf32>
    %206 = vector.shape_cast %205 : vector<1x1x32xf32> to vector<1x32xf32>
    %207 = vector.broadcast %206 : vector<1x32xf32> to vector<8x32xf32>
    %208 = arith.addf %204, %207 : vector<8x32xf32>
    %209 = arith.addf %154, %208 : vector<8x32xf32>
    %c1_97 = arith.constant 1 : index
    %c0_98 = arith.constant 0 : index
    %c0_99 = arith.constant 0 : index
    %210 = vector.load %arg8[%c1_97, %c0_98, %c0_99] : memref<2x1x32xf32, #tpu.memory_space<vmem>>, vector<1x1x32xf32>
    %211 = vector.shape_cast %210 : vector<1x1x32xf32> to vector<1x32xf32>
    %c1_100 = arith.constant 1 : index
    %c0_101 = arith.constant 0 : index
    %c0_102 = arith.constant 0 : index
    %212 = vector.load %arg9[%c1_100, %c0_101, %c0_102] : memref<2x1x32xf32, #tpu.memory_space<vmem>>, vector<1x1x32xf32>
    %213 = vector.shape_cast %212 : vector<1x1x32xf32> to vector<1x32xf32>
    %cst_103 = arith.constant dense<0.000000e+00> : vector<8xf32>
    %214 = vector.multi_reduction <add>, %209, %cst_103 [1] : vector<8x32xf32> to vector<8xf32>
    %215 = vector.shape_cast %214 : vector<8xf32> to vector<8x1xf32>
    %cst_104 = arith.constant 3.200000e+01 : f32
    %216 = vector.broadcast %cst_104 : f32 to vector<8x1xf32>
    %217 = arith.divf %215, %216 : vector<8x1xf32>
    %218 = vector.broadcast %217 : vector<8x1xf32> to vector<8x32xf32>
    %219 = arith.subf %209, %218 : vector<8x32xf32>
    %220 = arith.mulf %219, %219 : vector<8x32xf32>
    %cst_105 = arith.constant dense<0.000000e+00> : vector<8xf32>
    %221 = vector.multi_reduction <add>, %220, %cst_105 [1] : vector<8x32xf32> to vector<8xf32>
    %222 = vector.shape_cast %221 : vector<8xf32> to vector<8x1xf32>
    %cst_106 = arith.constant 3.200000e+01 : f32
    %223 = vector.broadcast %cst_106 : f32 to vector<8x1xf32>
    %224 = arith.divf %222, %223 : vector<8x1xf32>
    %cst_107 = arith.constant 9.99999996E-13 : f32
    %225 = vector.broadcast %cst_107 : f32 to vector<8x1xf32>
    %226 = arith.addf %224, %225 : vector<8x1xf32>
    %227 = math.rsqrt %226 : vector<8x1xf32>
    %228 = vector.broadcast %227 : vector<8x1xf32> to vector<8x32xf32>
    %229 = arith.mulf %219, %228 : vector<8x32xf32>
    %230 = vector.broadcast %211 : vector<1x32xf32> to vector<8x32xf32>
    %231 = arith.mulf %229, %230 : vector<8x32xf32>
    %232 = vector.broadcast %213 : vector<1x32xf32> to vector<8x32xf32>
    %233 = arith.addf %231, %232 : vector<8x32xf32>
    %c1_108 = arith.constant 1 : index
    %c0_109 = arith.constant 0 : index
    %c0_110 = arith.constant 0 : index
    %234 = vector.load %arg10[%c1_108, %c0_109, %c0_110] : memref<2x32x64xf32, #tpu.memory_space<vmem>>, vector<1x32x64xf32>
    %235 = vector.shape_cast %234 : vector<1x32x64xf32> to vector<32x64xf32>
    %cst_111 = arith.constant dense<0.000000e+00> : vector<8x64xf32>
    %236 = tpu.matmul %233, %235, %cst_111 {dimension_numbers = #tpu.dot_dimension_numbers<[1], [0], [0], [1], [0, 0, 1, 1], [], []>} : vector<8x32xf32>, vector<32x64xf32>, vector<8x64xf32> -> vector<8x64xf32>
    %c1_112 = arith.constant 1 : index
    %c0_113 = arith.constant 0 : index
    %c0_114 = arith.constant 0 : index
    %237 = vector.load %arg11[%c1_112, %c0_113, %c0_114] : memref<2x1x64xf32, #tpu.memory_space<vmem>>, vector<1x1x64xf32>
    %238 = vector.shape_cast %237 : vector<1x1x64xf32> to vector<1x64xf32>
    %239 = vector.broadcast %238 : vector<1x64xf32> to vector<8x64xf32>
    %240 = arith.addf %236, %239 : vector<8x64xf32>
    %cst_115 = arith.constant 5.000000e-01 : f32
    %241 = vector.broadcast %cst_115 : f32 to vector<8x64xf32>
    %242 = arith.mulf %241, %240 : vector<8x64xf32>
    %cst_116 = arith.constant 4.471500e-02 : f32
    %243 = vector.broadcast %cst_116 : f32 to vector<8x64xf32>
    %244 = arith.mulf %243, %240 : vector<8x64xf32>
    %245 = arith.mulf %244, %240 : vector<8x64xf32>
    %246 = arith.mulf %245, %240 : vector<8x64xf32>
    %247 = arith.addf %240, %246 : vector<8x64xf32>
    %cst_117 = arith.constant 0.797884583 : f32
    %248 = vector.broadcast %cst_117 : f32 to vector<8x64xf32>
    %249 = arith.mulf %248, %247 : vector<8x64xf32>
    %250 = math.tanh %249 : vector<8x64xf32>
    %cst_118 = arith.constant 1.000000e+00 : f32
    %251 = vector.broadcast %cst_118 : f32 to vector<8x64xf32>
    %252 = arith.addf %251, %250 : vector<8x64xf32>
    %253 = arith.mulf %242, %252 : vector<8x64xf32>
    %c1_119 = arith.constant 1 : index
    %c0_120 = arith.constant 0 : index
    %c0_121 = arith.constant 0 : index
    %254 = vector.load %arg12[%c1_119, %c0_120, %c0_121] : memref<2x64x32xf32, #tpu.memory_space<vmem>>, vector<1x64x32xf32>
    %255 = vector.shape_cast %254 : vector<1x64x32xf32> to vector<64x32xf32>
    %cst_122 = arith.constant dense<0.000000e+00> : vector<8x32xf32>
    %256 = tpu.matmul %253, %255, %cst_122 {dimension_numbers = #tpu.dot_dimension_numbers<[1], [0], [0], [1], [0, 0, 1, 1], [], []>} : vector<8x64xf32>, vector<64x32xf32>, vector<8x32xf32> -> vector<8x32xf32>
    %c1_123 = arith.constant 1 : index
    %c0_124 = arith.constant 0 : index
    %c0_125 = arith.constant 0 : index
    %257 = vector.load %arg13[%c1_123, %c0_124, %c0_125] : memref<2x1x32xf32, #tpu.memory_space<vmem>>, vector<1x1x32xf32>
    %258 = vector.shape_cast %257 : vector<1x1x32xf32> to vector<1x32xf32>
    %259 = vector.broadcast %258 : vector<1x32xf32> to vector<8x32xf32>
    %260 = arith.addf %256, %259 : vector<8x32xf32>
    %261 = arith.addf %233, %260 : vector<8x32xf32>
    %c1_126 = arith.constant 1 : index
    %c0_127 = arith.constant 0 : index
    %c0_128 = arith.constant 0 : index
    %262 = vector.load %arg14[%c1_126, %c0_127, %c0_128] : memref<2x1x32xf32, #tpu.memory_space<vmem>>, vector<1x1x32xf32>
    %263 = vector.shape_cast %262 : vector<1x1x32xf32> to vector<1x32xf32>
    %c1_129 = arith.constant 1 : index
    %c0_130 = arith.constant 0 : index
    %c0_131 = arith.constant 0 : index
    %264 = vector.load %arg15[%c1_129, %c0_130, %c0_131] : memref<2x1x32xf32, #tpu.memory_space<vmem>>, vector<1x1x32xf32>
    %265 = vector.shape_cast %264 : vector<1x1x32xf32> to vector<1x32xf32>
    %cst_132 = arith.constant dense<0.000000e+00> : vector<8xf32>
    %266 = vector.multi_reduction <add>, %261, %cst_132 [1] : vector<8x32xf32> to vector<8xf32>
    %267 = vector.shape_cast %266 : vector<8xf32> to vector<8x1xf32>
    %cst_133 = arith.constant 3.200000e+01 : f32
    %268 = vector.broadcast %cst_133 : f32 to vector<8x1xf32>
    %269 = arith.divf %267, %268 : vector<8x1xf32>
    %270 = vector.broadcast %269 : vector<8x1xf32> to vector<8x32xf32>
    %271 = arith.subf %261, %270 : vector<8x32xf32>
    %272 = arith.mulf %271, %271 : vector<8x32xf32>
    %cst_134 = arith.constant dense<0.000000e+00> : vector<8xf32>
    %273 = vector.multi_reduction <add>, %272, %cst_134 [1] : vector<8x32xf32> to vector<8xf32>
    %274 = vector.shape_cast %273 : vector<8xf32> to vector<8x1xf32>
    %cst_135 = arith.constant 3.200000e+01 : f32
    %275 = vector.broadcast %cst_135 : f32 to vector<8x1xf32>
    %276 = arith.divf %274, %275 : vector<8x1xf32>
    %cst_136 = arith.constant 9.99999996E-13 : f32
    %277 = vector.broadcast %cst_136 : f32 to vector<8x1xf32>
    %278 = arith.addf %276, %277 : vector<8x1xf32>
    %279 = math.rsqrt %278 : vector<8x1xf32>
    %280 = vector.broadcast %279 : vector<8x1xf32> to vector<8x32xf32>
    %281 = arith.mulf %271, %280 : vector<8x32xf32>
    %282 = vector.broadcast %263 : vector<1x32xf32> to vector<8x32xf32>
    %283 = arith.mulf %281, %282 : vector<8x32xf32>
    %284 = vector.broadcast %265 : vector<1x32xf32> to vector<8x32xf32>
    %285 = arith.addf %283, %284 : vector<8x32xf32>
    %286 = vector.extract_strided_slice %285 {offsets = [0, 0], sizes = [1, 32], strides = [1, 1]} : vector<8x32xf32> to vector<1x32xf32>
    %c0_137 = arith.constant 0 : index
    %c0_138 = arith.constant 0 : index
    %287 = vector.load %arg16[%c0_137, %c0_138] : memref<32x32xf32, #tpu.memory_space<vmem>>, vector<32x32xf32>
    %cst_139 = arith.constant dense<0.000000e+00> : vector<1x32xf32>
    %288 = tpu.matmul %286, %287, %cst_139 {dimension_numbers = #tpu.dot_dimension_numbers<[1], [0], [0], [1], [0, 0, 1, 1], [], []>} : vector<1x32xf32>, vector<32x32xf32>, vector<1x32xf32> -> vector<1x32xf32>
    %c0_140 = arith.constant 0 : index
    %c0_141 = arith.constant 0 : index
    %289 = vector.load %arg17[%c0_140, %c0_141] : memref<1x32xf32, #tpu.memory_space<vmem>>, vector<1x32xf32>
    %290 = arith.addf %288, %289 : vector<1x32xf32>
    %291 = math.tanh %290 : vector<1x32xf32>
    %c0_142 = arith.constant 0 : index
    %c0_143 = arith.constant 0 : index
    %292 = vector.load %arg18[%c0_142, %c0_143] : memref<32x128xf32, #tpu.memory_space<vmem>>, vector<32x128xf32>
    %cst_144 = arith.constant dense<0.000000e+00> : vector<1x128xf32>
    %293 = tpu.matmul %291, %292, %cst_144 {dimension_numbers = #tpu.dot_dimension_numbers<[1], [0], [0], [1], [0, 0, 1, 1], [], []>} : vector<1x32xf32>, vector<32x128xf32>, vector<1x128xf32> -> vector<1x128xf32>
    %c0_145 = arith.constant 0 : index
    %c0_146 = arith.constant 0 : index
    %294 = vector.load %arg19[%c0_145, %c0_146] : memref<1x128xf32, #tpu.memory_space<vmem>>, vector<1x128xf32>
    %295 = arith.addf %293, %294 : vector<1x128xf32>
    %c0_147 = arith.constant 0 : index
    %c0_148 = arith.constant 0 : index
    %c0_149 = arith.constant 0 : index
    %296 = vector.load %arg20[%c0_147, %c0_148, %c0_149] : memref<1x1x128xf32, #tpu.memory_space<vmem>>, vector<1x1x128xf32>
    %297 = vector.shape_cast %296 : vector<1x1x128xf32> to vector<1x128xf32>
    %298 = vector.shape_cast %295 : vector<1x128xf32> to vector<1x1x128xf32>
    tpu.vector_store %arg20[%c0_147, %c0_148, %c0_149], %298 {strides = array<i32>} : memref<1x1x128xf32, #tpu.memory_space<vmem>>, vector<1x1x128xf32>,
    return
  }
  func.func @transform_0(%arg0: i32) -> (i32, i32, i32) {
    %c0_i32 = arith.constant 0 : i32
    %c0_i32_0 = arith.constant 0 : i32
    %c0_i32_1 = arith.constant 0 : i32
    return %arg0, %c0_i32, %c0_i32_0 : i32, i32, i32
  }
  func.func @transform_1(%arg0: i32) -> (i32, i32) {
    %c0_i32 = arith.constant 0 : i32
    %c0_i32_0 = arith.constant 0 : i32
    %c0_i32_1 = arith.constant 0 : i32
    return %c0_i32, %c0_i32_0 : i32, i32
  }
  func.func @transform_2(%arg0: i32) -> (i32, i32) {
    %c0_i32 = arith.constant 0 : i32
    %c0_i32_0 = arith.constant 0 : i32
    %c0_i32_1 = arith.constant 0 : i32
    return %c0_i32, %c0_i32_0 : i32, i32
  }
  func.func @transform_3(%arg0: i32) -> (i32, i32, i32) {
    %c0_i32 = arith.constant 0 : i32
    %c0_i32_0 = arith.constant 0 : i32
    %c0_i32_1 = arith.constant 0 : i32
    %c0_i32_2 = arith.constant 0 : i32
    return %c0_i32, %c0_i32_0, %c0_i32_1 : i32, i32, i32
  }
  func.func @transform_4(%arg0: i32) -> (i32, i32, i32) {
    %c0_i32 = arith.constant 0 : i32
    %c0_i32_0 = arith.constant 0 : i32
    %c0_i32_1 = arith.constant 0 : i32
    %c0_i32_2 = arith.constant 0 : i32
    return %c0_i32, %c0_i32_0, %c0_i32_1 : i32, i32, i32
  }
  func.func @transform_5(%arg0: i32) -> (i32, i32, i32) {
    %c0_i32 = arith.constant 0 : i32
    %c0_i32_0 = arith.constant 0 : i32
    %c0_i32_1 = arith.constant 0 : i32
    %c0_i32_2 = arith.constant 0 : i32
    return %c0_i32, %c0_i32_0, %c0_i32_1 : i32, i32, i32
  }
  func.func @transform_6(%arg0: i32) -> (i32, i32, i32) {
    %c0_i32 = arith.constant 0 : i32
    %c0_i32_0 = arith.constant 0 : i32
    %c0_i32_1 = arith.constant 0 : i32
    %c0_i32_2 = arith.constant 0 : i32
    return %c0_i32, %c0_i32_0, %c0_i32_1 : i32, i32, i32
  }
  func.func @transform_7(%arg0: i32) -> (i32, i32, i32) {
    %c0_i32 = arith.constant 0 : i32
    %c0_i32_0 = arith.constant 0 : i32
    %c0_i32_1 = arith.constant 0 : i32
    %c0_i32_2 = arith.constant 0 : i32
    return %c0_i32, %c0_i32_0, %c0_i32_1 : i32, i32, i32
  }
  func.func @transform_8(%arg0: i32) -> (i32, i32, i32) {
    %c0_i32 = arith.constant 0 : i32
    %c0_i32_0 = arith.constant 0 : i32
    %c0_i32_1 = arith.constant 0 : i32
    %c0_i32_2 = arith.constant 0 : i32
    return %c0_i32, %c0_i32_0, %c0_i32_1 : i32, i32, i32
  }
  func.func @transform_9(%arg0: i32) -> (i32, i32, i32) {
    %c0_i32 = arith.constant 0 : i32
    %c0_i32_0 = arith.constant 0 : i32
    %c0_i32_1 = arith.constant 0 : i32
    %c0_i32_2 = arith.constant 0 : i32
    return %c0_i32, %c0_i32_0, %c0_i32_1 : i32, i32, i32
  }
  func.func @transform_10(%arg0: i32) -> (i32, i32, i32) {
    %c0_i32 = arith.constant 0 : i32
    %c0_i32_0 = arith.constant 0 : i32
    %c0_i32_1 = arith.constant 0 : i32
    %c0_i32_2 = arith.constant 0 : i32
    return %c0_i32, %c0_i32_0, %c0_i32_1 : i32, i32, i32
  }
  func.func @transform_11(%arg0: i32) -> (i32, i32, i32) {
    %c0_i32 = arith.constant 0 : i32
    %c0_i32_0 = arith.constant 0 : i32
    %c0_i32_1 = arith.constant 0 : i32
    %c0_i32_2 = arith.constant 0 : i32
    return %c0_i32, %c0_i32_0, %c0_i32_1 : i32, i32, i32
  }
  func.func @transform_12(%arg0: i32) -> (i32, i32, i32) {
    %c0_i32 = arith.constant 0 : i32
    %c0_i32_0 = arith.constant 0 : i32
    %c0_i32_1 = arith.constant 0 : i32
    %c0_i32_2 = arith.constant 0 : i32
    return %c0_i32, %c0_i32_0, %c0_i32_1 : i32, i32, i32
  }
  func.func @transform_13(%arg0: i32) -> (i32, i32, i32) {
    %c0_i32 = arith.constant 0 : i32
    %c0_i32_0 = arith.constant 0 : i32
    %c0_i32_1 = arith.constant 0 : i32
    %c0_i32_2 = arith.constant 0 : i32
    return %c0_i32, %c0_i32_0, %c0_i32_1 : i32, i32, i32
  }
  func.func @transform_14(%arg0: i32) -> (i32, i32, i32) {
    %c0_i32 = arith.constant 0 : i32
    %c0_i32_0 = arith.constant 0 : i32
    %c0_i32_1 = arith.constant 0 : i32
    %c0_i32_2 = arith.constant 0 : i32
    return %c0_i32, %c0_i32_0, %c0_i32_1 : i32, i32, i32
  }
  func.func @transform_15(%arg0: i32) -> (i32, i32) {
    %c0_i32 = arith.constant 0 : i32
    %c0_i32_0 = arith.constant 0 : i32
    %c0_i32_1 = arith.constant 0 : i32
    return %c0_i32, %c0_i32_0 : i32, i32
  }
  func.func @transform_16(%arg0: i32) -> (i32, i32) {
    %c0_i32 = arith.constant 0 : i32
    %c0_i32_0 = arith.constant 0 : i32
    %c0_i32_1 = arith.constant 0 : i32
    return %c0_i32, %c0_i32_0 : i32, i32
  }
  func.func @transform_17(%arg0: i32) -> (i32, i32) {
    %c0_i32 = arith.constant 0 : i32
    %c0_i32_0 = arith.constant 0 : i32
    %c0_i32_1 = arith.constant 0 : i32
    return %c0_i32, %c0_i32_0 : i32, i32
  }
  func.func @transform_18(%arg0: i32) -> (i32, i32) {
    %c0_i32 = arith.constant 0 : i32
    %c0_i32_0 = arith.constant 0 : i32
    %c0_i32_1 = arith.constant 0 : i32
    return %c0_i32, %c0_i32_0 : i32, i32
  }
  func.func @transform_19(%arg0: i32) -> (i32, i32, i32) {
    %c0_i32 = arith.constant 0 : i32
    %c0_i32_0 = arith.constant 0 : i32
    %c0_i32_1 = arith.constant 0 : i32
    return %arg0, %c0_i32, %c0_i32_0 : i32, i32, i32
  }
}

</mosaic_0001>

<bundles_post_ra>
// kernel: _lambda_.1
= control target key start
LH: loop header
LB: loop body
LE: loop exit
PB: predicated region body
PF: predicated region fallthrough
CT: control target
= control target key end

     0   :  { %s3436_s0 = inlined_call_operand.vmem [shape: f32[2,8,32], index: 0, kind: input, shape index: {}]   ;;  %s3437_s1 = inlined_call_operand.vmem [shape: f32[1,32], index: 1, kind: input, shape index: {}]   ;;  %s3438_s2 = inlined_call_operand.vmem [shape: f32[1,32], index: 2, kind: input, shape index: {}]   ;;  %s3439_s3 = inlined_call_operand.vmem [shape: f32[2,32,96], index: 3, kind: input, shape index: {}]   ;;  %s3440_s4 = inlined_call_operand.vmem [shape: f32[2,1,96], index: 4, kind: input, shape index: {}]   ;;  %s3441_s5 = inlined_call_operand.vmem [shape: f32[2,32,32], index: 5, kind: input, shape index: {}]   ;;  %s3442_s6 = inlined_call_operand.vmem [shape: f32[2,1,32], index: 6, kind: input, shape index: {}]   ;;  %s3443_s7 = inlined_call_operand.vmem [shape: f32[2,1,32], index: 7, kind: input, shape index: {}]   ;;  %s3444_s8 = inlined_call_operand.vmem [shape: f32[2,1,32], index: 8, kind: input, shape index: {}]   ;;  %s3445_s9 = inlined_call_operand.vmem [shape: f32[2,32,64], index: 9, kind: input, shape index: {}]   ;;  %s3446_s10 = inlined_call_operand.vmem [shape: f32[2,1,64], index: 10, kind: input, shape index: {}]   ;;  %s3447_s11 = inlined_call_operand.vmem [shape: f32[2,64,32], index: 11, kind: input, shape index: {}]   ;;  %s3448_s12 = inlined_call_operand.vmem [shape: f32[2,1,32], index: 12, kind: input, shape index: {}]   ;;  %s3449_s13 = inlined_call_operand.vmem [shape: f32[2,1,32], index: 13, kind: input, shape index: {}]   ;;  %s3450_s14 = inlined_call_operand.vmem [shape: f32[2,1,32], index: 14, kind: input, shape index: {}]   ;;  %s3451_s15 = inlined_call_operand.vmem [shape: f32[32,32], index: 15, kind: input, shape index: {}]   ;;  %s3452_s16 = inlined_call_operand.vmem [shape: f32[1,32], index: 16, kind: input, shape index: {}]   ;;  %s3453_s17 = inlined_call_operand.vmem [shape: f32[32,128], index: 17, kind: input, shape index: {}]   ;;  %s3454_s18 = inlined_call_operand.vmem [shape: f32[1,128], index: 18, kind: input, shape index: {}]   ;;  %s3455_s19 = inlined_call_operand.hbm [shape: f32[2,1,128], index: 19, kind: output, shape index: {}]  }
   0x1   :  { %3468 = sst [smem:[#allocation9_spill]] %s3436_s0 }
   0x2   :  { %3469 = sst [smem:[#allocation10_spill]] %s3437_s1 }
   0x3   :  { %3470 = sst [smem:[#allocation11_spill]] %s3438_s2 }
   0x4   :  { %3471 = sst [smem:[#allocation12_spill]] %s3439_s3 }
   0x5   :  { %3472 = sst [smem:[#allocation13_spill]] %s3440_s4 }
   0x6   :  { %24 = vsyncpa [#allocation3], 0 }
   0x7   :  { %26 = vsyncpa [#allocation3 + $0x1], 0  ;;  %s3002_s0 = smov 0   ;;  %s3004_s30 = smov 0  }
   0x8   :  { %s3006_s20 = smov 0   ;;  %s3008_s21 = smov 0  }
   0x9 LB: > { %3473 = sst [smem:[#allocation5_spill]] %s2886_s20  ;;  %s3023_s1 = sadd.s32 4294967295, %s2890_s21   ;;  %s2890_s21 = sphi %s3008_s21, %s3491_s21   ;;  %s2886_s20 = sphi %s3006_s20, %s3493_s20   ;;  %s2882_s30 = sphi %s3004_s30, %s3495_s30   ;;  %s2878_s0 = sphi %s3002_s0, %s3494_s0  }
   0xa   : > { %s2360_s22 = sadd.s32 4294967294, %s2890_s21   ;;  %s3027_s2 = sadd.s32 1, %s2890_s21  }
   0xb   : > { %3474 = sst [smem:[#allocation6_spill]] %s3027_s2  ;;  %s443_s23 = sadd.s32 1, %s2886_s20 }
   0xc   : > { %s440_s24 = ssub.s32 %s2890_s21, %s3027_s2  ;;  %p453_p0 = scmp.ne.s32.totalorder %s2886_s20, %s2882_s30 }
   0xd   : > { %p441_p1 = scmp.eq.s32.totalorder %s440_s24, 0  ;;  %p454_p2 = scmp.eq.s32.totalorder %s3023_s1, 1 }
   0xe   : > { %p459_p3 = scmp.ne.s32.totalorder %s2882_s30, %s2878_s0  ;;  %p460_p4 = scmp.eq.s32.totalorder %s2360_s22, 1 }
   0xf   : > { %s3038_s25 = scalar_select %p441_p1, %s2886_s20, %s443_s23  }
  0x10   : > { %p3040_p5 = por %p454_p2, %p453_p0  ;;  %p3044_p6 = por %p460_p4, %p459_p3 }
  0x11   : > { %3475 = sst [smem:[#allocation7_spill]] %s3038_s25  ;;  %p2363_p7 = scmp.ge.s32.totalorder %s2890_s21, 1 }
  0x12   : > { %s3477_s26 = scalar_select %p3044_p6, 1, 0 }
  0x13   : > { %p539_p8 = scmp.lt.s32.totalorder %s2890_s21, 3 }
  0x14   : > { %3478 = sst [smem:[#allocation8_spill]] %s3477_s26 }
  0x15   : > { %p540_p9 = pnand %p2363_p7, %p539_p8 }
  0x16   : > { %p593_p10 = scmp.lt.s32.totalorder (!%p540_p9), %s3023_s1, 1  ;;  %vm600_vm0 = vcmask (!%p540_p9), 261120   ;;  %s3479_s23 = sld [smem:[#allocation9_spill]] (!%p540_p9)  ;;  %v2892_v10 = vmov (!%p540_p9), 0.0|0.0   ;;  %vm2893_vm1 = vmmov (!%p540_p9), 0   ;;  %v2894_v13 = vmov (!%p540_p9), 0.0  }
  0x17   : > { %543 = sbr.rel (%p540_p9) target bundleno = 5779 (0x1693), region = 96  ;;  %s3480_s2 = sld [smem:[#allocation12_spill]] (!%p540_p9)  ;;  %2676 = vmatprep.subr.bf16.mxu0 (!%p540_p9), %v2892_v10  ;;  %2518 = vmatprep.mubr.msk.f32.mxu0 (!%p540_p9), %vm2893_vm1, %v2894_v13  ;;  %vm716_vm2 = vcmask (!%p540_p9), 130048   ;;  %vm792_vm3 = vcmask (!%p540_p9), 64512   ;;  %v1051_v57 = vld [vmem:[%s3441_s5] sm:$0xff] (!%p540_p9)  ;;  %v1052_v58 = vld [vmem:[%s3441_s5 + $0x8] sm:$0xff] (!%p540_p9) }
  0x18   : > { %2521 = vmatprep.subr.mxu1 (!%p540_p9), %v2894_v13  ;;  %2523 = vmatprep.mubr.msk.f32.mxu1 (!%p540_p9), %vm2893_vm1, %v2894_v13  ;;  %s3481_s26 = sld [smem:[#allocation10_spill]] (!%p540_p9)  ;;  %s3483_s4 = sld [smem:[#allocation13_spill]] (!%p540_p9)  ;;  %v1053_v59 = vld [vmem:[%s3441_s5 + $0x10] sm:$0xff] (!%p540_p9)  ;;  %v2683_v60 = vpack.c.bf16 (!%p540_p9), %v1052_v58, %v1051_v57  ;;  %v1054_v61 = vld [vmem:[%s3441_s5 + $0x18] sm:$0xff] (!%p540_p9)  ;;  %vm1273_vm4 = vcmask (!%p540_p9), 523264  }
  0x19   : > { %s3464_s20 = smov (!%p540_p9), 96   ;;  %s3466_s25 = smov (!%p540_p9), 80   ;;  %v2686_v62 = vpack.c.bf16 (!%p540_p9), %v1054_v61, %v1053_v59  ;;  %v2381_v58 = vld [vmem:[%s3448_s12] ss:$0 sm:$0xff] (!%p540_p9) }
  0x1a   : > { %s3485_s29 = smov (!%p540_p9), 96   ;;  %s3487_s22 = smov (!%p540_p9), 64  }
  0x1d   : > { %v629_v7 = vld [vmem:[%s3480_s2] sm:$0xff] (!%p540_p9)  ;;  %v630_v8 = vld [vmem:[%s3480_s2 + $0x8] sm:$0xff] (!%p540_p9)  ;;  %v631_v9 = vld [vmem:[%s3480_s2 + $0x10] sm:$0xff] (!%p540_p9) }
  0x1e   : > { %s594_s27 = scalar_select %p593_p10, %s3023_s1, 1  ;;  %v2677_v11 = vpack.c.bf16 %v630_v8, %v629_v7  ;;  %v632_v12 = vld [vmem:[%s3480_s2 + $0x18] sm:$0xff]  ;;  %v2365_v19 = vld [vmem:[%s3481_s26] ss:$0 sm:$0xff] }
  0x1f   : > { %v2680_v14 = vpack.c.bf16 %v632_v12, %v631_v9  ;;  %v2367_v24 = vld [vmem:[%s3483_s4] ss:$0 sm:$0xff]  ;;  %s3461_s26 = smov 48  }
  0x20   : > { %s2364_s28 = sshll.u32 %s594_s27, 3  ;;  %2678 = vmatpush3.bf16.msra.mxu0 %v2677_v11  ;;  %s3465_s27 = smov 16  }
  0x21   : > { %s596_s24 = scalar_lea.vmem %s3479_s23, %s2364_s28  ;;  %2679 = vmatprep.subr.bf16.mxu0 %v2892_v10  ;;  %s3482_s28 = sld [smem:[#allocation11_spill]] }
  0x22   : > { %v597_v0 = vld [vmem:[%s596_s24] sm:$0xff]  ;;  %s3463_s23 = smov 112   ;;  %s3462_s24 = smov 64  }
  0x23   : > { %v601_v1 = vsel %vm600_vm0, %v597_v0, 0.0 }
  0x24   : > { %602 = vadd.xlane.f32.xlu0 %v601_v1  ;;  %2681 = vmatpush3.bf16.msra.mxu0 %v2680_v14 }
  0x25   : > { %2531 = vmatprep.subr.mxu0 %v2894_v13 }
  0x27   : > { %v2366_v21 = vld [vmem:[%s3482_s28] ss:$0 sm:$0xff] }
  0xb1   : > { %v603_v2 = vpop.xlane.xlu0 %602 }
  0xb2   : > { %v605_v3 = vmul.f32 0.03125, %v603_v2 }
  0xb4   : > { %v606_v4 = vsub.f32 %v597_v0, %v605_v3 }
  0xb6   : > { %v607_v5 = vmul.f32 %v606_v4, %v606_v4 }
  0xb8   : > { %v608_v6 = vsel %vm600_vm0, %v607_v5, 0.0  ;;  %v2375_v5 = vld [vmem:[%s3442_s6] ss:$0 sm:$0xff] }
  0xb9   : > { %609 = vadd.xlane.f32.xlu0 %v608_v6 }
 0x146   : > { %v610_v15 = vpop.xlane.xlu0 %609 }
 0x147   : > { %v611_v16 = vmul.f32 0.03125, %v610_v15 }
 0x149   : > { %v612_v17 = vadd.f32 1e-12, %v611_v16 }
 0x14b   : > { %2796 = vrsqrt.f32 %v612_v17 }
 0x155   : > { %v2797_v18 = vpop.eup %2796 }
 0x156   : > { %v614_v20 = vmul.f32 %v2797_v18, %v606_v4  ;;  %v1165_v18 = vld [vmem:[%s3445_s9] sm:$0xff] }
 0x158   : > { %v621_v22 = vmul.f32 %v2365_v19, %v614_v20  ;;  %v1166_v19 = vld [vmem:[%s3445_s9 + $0x8] sm:$0xff] }
 0x159   : > { %v2689_v20 = vpack.c.bf16 %v1166_v19, %v1165_v18  ;;  %v2384_v19 = vld [vmem:[%s3450_s14] ss:$0 sm:$0xff] }
 0x15a   : > { %v3083_v23 = vadd.f32 %v2366_v21, %v621_v22  ;;  %v1167_v21 = vld [vmem:[%s3445_s9 + $0x10] sm:$0xff]  ;;  %v1168_v22 = vld [vmem:[%s3445_s9 + $0x18] sm:$0xff] }
 0x15c   : > { %2519 = vmatmul.mubr.msk.f32.vlgmr.msra.gmra.mrb[0].mxu0 %vm600_vm0, %v3083_v23 }
 0x15d   : > { %2533 = vmatprep.mubr.msk.f32.mxu0 %vm2893_vm1, %v2894_v13 }
 0x22f   : > { %v709_v25 = vpop.f32.mrb[0].mxu0 }
 0x230   : > { %v710_v26 = vadd.f32 %v2367_v24, %v709_v25  ;;  %v2520_v27 = vpop.f32.mrb[1].mxu0 }
 0x232   : > { %880 = vrot.lane.b32.xlu0 %v710_v26, %s3463_s23  ;;  %714 = vrot.lane.b32.xlu1 %v710_v26, %s3464_s20  ;;  %s3488_s23 = smov 48  }
 0x236   : > { %882 = vrot.lane.b32.xlu1 %v710_v26, %s3466_s25  ;;  %s3484_s25 = smov 80  }
 0x2a4   : > { %v715_v28 = vpop.permute.xlu1 %714  ;;  %v881_v30 = vpop.permute.xlu0 %880 }
 0x2a5   : > { %2522 = vmatpush3.xpose.msk.msra.mxu1 %vm716_vm2, %v715_v28  ;;  %v2377_v28 = vld [vmem:[%s3443_s7] ss:$0 sm:$0xff] }
 0x2a6   : > { %2526 = vmatprep.subr.mxu1 %v2894_v13 }
 0x2a8   : > { %2524 = vmatmul.mubr.msk.f32.vlgmr.msra.gmra.mrb[0].mxu1 %vm716_vm2, %v710_v26  ;;  %v883_v29 = vpop.permute.xlu1 %882 }
 0x2a9   : > { %2532 = vmatpush3.xpose.msk.msra.mxu0 %vm716_vm2, %v883_v29  ;;  %2528 = vmatprep.mubr.msk.f32.mxu1 %vm2893_vm1, %v2894_v13 }
 0x2aa   : > { %2682 = vmatprep.subr.bf16.mxu0 %v2892_v10 }
 0x2ac   : > { %2534 = vmatmul.mubr.msk.f32.vlgmr.msra.gmra.mrb[2].mxu0 %vm716_vm2, %v881_v30  ;;  %v2378_v30 = vld [vmem:[%s3444_s8] ss:$0 sm:$0xff] }
 0x2ad   : > { %2549 = vmatprep.mubr.msk.f32.mxu0 %vm2893_vm1, %v2894_v13  ;;  %2684 = vmatpush3.bf16.msra.mxu0 %v2683_v60 }
 0x2ae   : > { %2685 = vmatprep.subr.bf16.mxu0 %v2892_v10 }
 0x2b1   : > { %2687 = vmatpush3.bf16.msra.mxu0 %v2686_v62 }
 0x2b2   : > { %2694 = vmatprep.subr.bf16.mxu0 %v2892_v10 }
 0x37b   : > { %v787_v31 = vpop.f32.mrb[0].mxu1 }
 0x37c   : > { %v791_v32 = vmul.f32 0.25, %v787_v31  ;;  %v2525_v33 = vpop.f32.mrb[1].mxu1 }
 0x37d   : > { %v1258_v33 = vld [vmem:[%s3447_s11] sm:$0xff] }
 0x37e   : > { %v793_v34 = vsel %vm792_vm3, %v791_v32, -inf }
 0x37f   : > { %794 = vmax.xlane.f32.xlu1 %v793_v34  ;;  %v954_v35 = vpop.f32.mrb[2].mxu0  ;;  %v1259_v34 = vld [vmem:[%s3447_s11 + $0x8] sm:$0xff] }
 0x380   : > { %v958_v36 = vmul.f32 0.25, %v954_v35  ;;  %v2535_v37 = vpop.f32.mrb[3].mxu0  ;;  %v2695_v35 = vpack.c.bf16 %v1259_v34, %v1258_v33 }
 0x381   : > { %v1261_v37 = vld [vmem:[%s3447_s11 + $0x18] sm:$0xff] }
 0x382   : > { %v959_v38 = vsel %vm792_vm3, %v958_v36, -inf }
 0x383   : > { %960 = vmax.xlane.f32.xlu0 %v959_v38 }
 0x399   : > { %970 = vrot.lane.b32.xlu0 %v710_v26, %s3461_s26 }
 0x40c   : > { %v795_v39 = vpop.xlane.xlu1 %794 }
 0x40d   : > { %v796_v40 = vsub.f32 %v791_v32, %v795_v39  ;;  %v1262_v39 = vld [vmem:[%s3447_s11 + $0x20] sm:$0xff] }
 0x40f   : > { %v797_v41 = vmul.f32 1.442695, %v796_v40  ;;  %v1263_v40 = vld [vmem:[%s3447_s11 + $0x28] sm:$0xff] }
 0x410   : > { %v961_v42 = vpop.xlane.xlu0 %960 }
 0x411   : > { %2798 = vpow2.f32 %v797_v41  ;;  %v962_v43 = vsub.f32 %v958_v36, %v961_v42  ;;  %v1260_v36 = vld [vmem:[%s3447_s11 + $0x10] sm:$0xff]  ;;  %v2701_v41 = vpack.c.bf16 %v1263_v40, %v1262_v39 }
 0x412   : > { %v2698_v38 = vpack.c.bf16 %v1261_v37, %v1260_v36  ;;  %v1264_v42 = vld [vmem:[%s3447_s11 + $0x30] sm:$0xff] }
 0x413   : > { %v963_v44 = vmul.f32 1.442695, %v962_v43  ;;  %v1265_v43 = vld [vmem:[%s3447_s11 + $0x38] sm:$0xff] }
 0x414   : > { %v971_v54 = vpop.permute.xlu0 %970 }
 0x415   : > { %2800 = vpow2.f32 %v963_v44  ;;  %v2704_v44 = vpack.c.bf16 %v1265_v43, %v1264_v42 }
 0x41b   : > { %v2799_v45 = vpop.eup %2798 }
 0x41c   : > { %v799_v46 = vsel %vm792_vm3, %v2799_v45, 0.0 }
 0x41d   : > { %800 = vadd.xlane.f32.xlu1 %v799_v46 }
 0x41f   : > { %v2801_v47 = vpop.eup %2800 }
 0x420   : > { %v965_v48 = vsel %vm792_vm3, %v2801_v47, 0.0 }
 0x421   : > { %966 = vadd.xlane.f32.xlu1 %v965_v48 }
 0x432   : > { %804 = vrot.lane.b32.xlu1 %v710_v26, %s3462_s24  ;;  %s591_s24 = sand.u32 1, %s2882_s30  }
 0x4aa   : > { %v801_v49 = vpop.xlane.xlu1 %800 }
 0x4ab   : > { %2802 = vrcp.f32 %v801_v49 }
 0x4ae   : > { %v967_v50 = vpop.xlane.xlu1 %966 }
 0x4af   : > { %2804 = vrcp.f32 %v967_v50 }
 0x4b2   : > { %v805_v51 = vpop.permute.xlu1 %804 }
 0x4b3   : > { %2527 = vmatpush3.msra.mxu1 %v805_v51 }
 0x4b4   : > { %2536 = vmatprep.subr.mxu1 %v2894_v13 }
 0x4b5   : > { %v2803_v52 = vpop.eup %2802 }
 0x4b6   : > { %v803_v53 = vmul.f32 %v2803_v52, %v2799_v45  ;;  %v2379_v45 = vld [vmem:[%s3446_s10] ss:$0 sm:$0xff] }
 0x4b8   : > { %2529 = vmatmul.mubr.msk.f32.vlgmr.msra.gmra.mrb[2].mxu1 %vm792_vm3, %v803_v53 }
 0x4b9   : > { %v2805_v55 = vpop.eup %2804  ;;  %2537 = vmatpush3.msra.mxu1 %v971_v54  ;;  %2538 = vmatprep.mubr.msk.f32.mxu1 %vm2893_vm1, %v2894_v13 }
 0x4ba   : > { %v969_v56 = vmul.f32 %v2805_v55, %v2801_v47  ;;  %2688 = vmatprep.subr.bf16.mxu1 %v2892_v10 }
 0x4bc   : > { %2539 = vmatmul.mubr.msk.f32.vlgmr.msra.gmra.mrb[4].mxu1 %vm792_vm3, %v969_v56 }
 0x4bd   : > { %2560 = vmatprep.mubr.msk.f32.mxu1 %vm2893_vm1, %v2894_v13  ;;  %2690 = vmatpush3.bf16.msra.mxu1 %v2689_v20 }
 0x4be   : > { %2691 = vmatprep.subr.bf16.mxu1 %v2892_v10 }
 0x58b   : > { %v876_v63 = vpop.f32.mrb[2].mxu1 }
 0x58c   : > { %v2530_v0 = vpop.f32.mrb[3].mxu1 }
 0x58f   : > { %v1042_v1 = vpop.f32.mrb[4].mxu1 }
 0x590   : > { %1047 = vrot.lane.b32.xlu1 %v1042_v1, %s3465_s27  ;;  %v2540_v2 = vpop.f32.mrb[5].mxu1  ;;  %s3486_s27 = smov 112  }
 0x602   : > { %v1048_v3 = vpop.permute.xlu1 %1047 }
 0x603   : > { %v1050_v4 = vsel %vm716_vm2, %v876_v63, %v1048_v3 }
 0x604   : > { %2550 = vmatmul.mubr.msk.f32.vlgmr.msra.gmra.mrb[4].mxu0 %vm600_vm0, %v1050_v4 }
 0x605   : > { %2579 = vmatprep.mubr.msk.f32.mxu0 %vm2893_vm1, %v2894_v13  ;;  %2696 = vmatpush3.bf16.msra.mxu0 %v2695_v35 }
 0x606   : > { %2697 = vmatprep.subr.bf16.mxu0 %v2892_v10 }
 0x609   : > { %2699 = vmatpush3.bf16.msra.mxu0 %v2698_v38 }
 0x60a   : > { %2700 = vmatprep.subr.bf16.mxu0 %v2892_v10 }
 0x60d   : > { %2702 = vmatpush3.bf16.msra.mxu0 %v2701_v41 }
 0x60e   : > { %2703 = vmatprep.subr.bf16.mxu0 %v2892_v10 }
 0x611   : > { %2705 = vmatpush3.bf16.msra.mxu0 %v2704_v44 }
 0x612   : > { %2603 = vmatprep.subr.mxu0 %v2894_v13 }
 0x6d7   : > { %v1131_v6 = vpop.f32.mrb[4].mxu0 }
 0x6d8   : > { %v1132_v7 = vadd.f32 %v2375_v5, %v1131_v6  ;;  %v2551_v8 = vpop.f32.mrb[5].mxu0  ;;  %v2385_v5 = vld [vmem:[%s3480_s2 + $0x20] sm:$0xff]  ;;  %v2386_v6 = vld [vmem:[%s3480_s2 + $0x28] sm:$0xff] }
 0x6d9   : > { %v2387_v8 = vld [vmem:[%s3480_s2 + $0x30] sm:$0xff] }
 0x6da   : > { %v1135_v9 = vadd.f32 %v1132_v7, %v3083_v23  ;;  %v2692_v23 = vpack.c.bf16 %v1168_v22, %v1167_v21  ;;  %v2707_v7 = vpack.c.bf16 %v2386_v6, %v2385_v5  ;;  %v2390_v22 = vld [vmem:[%s3483_s4 + $0x1] ss:$0 sm:$0xff] }
 0x6dc   : > { %v1138_v11 = vsel %vm600_vm0, %v1135_v9, 0.0  ;;  %2693 = vmatpush3.bf16.msra.mxu1 %v2692_v23 }
 0x6dd   : > { %1139 = vadd.xlane.f32.xlu1 %v1138_v11  ;;  %2706 = vmatprep.subr.bf16.mxu1 %v2892_v10 }
 0x76a   : > { %v1140_v12 = vpop.xlane.xlu1 %1139 }
 0x76b   : > { %v1141_v14 = vmul.f32 0.03125, %v1140_v12 }
 0x76d   : > { %v1142_v15 = vsub.f32 %v1135_v9, %v1141_v14  ;;  %v2388_v9 = vld [vmem:[%s3480_s2 + $0x38] sm:$0xff]  ;;  %s2293_s2 = scalar_lea.sflag [#allocation3], %s591_s24 }
 0x76e   : > { %v2710_v11 = vpack.c.bf16 %v2388_v9, %v2387_v8 }
 0x76f   : > { %v1143_v16 = vmul.f32 %v1142_v15, %v1142_v15 }
 0x771   : > { %v1144_v17 = vsel %vm600_vm0, %v1143_v16, 0.0 }
 0x772   : > { %1145 = vadd.xlane.f32.xlu0 %v1144_v17  ;;  %v2383_v17 = vld [vmem:[%s3449_s13] ss:$0 sm:$0xff] }
 0x7ff   : > { %v1146_v24 = vpop.xlane.xlu0 %1145 }
 0x800   : > { %v1147_v25 = vmul.f32 0.03125, %v1146_v24 }
 0x802   : > { %v1148_v26 = vadd.f32 1e-12, %v1147_v25 }
 0x804   : > { %2806 = vrsqrt.f32 %v1148_v26 }
 0x80e   : > { %v2807_v27 = vpop.eup %2806 }
 0x80f   : > { %v1150_v29 = vmul.f32 %v2807_v27, %v1142_v15 }
 0x811   : > { %v1157_v31 = vmul.f32 %v2377_v28, %v1150_v29 }
 0x813   : > { %v1164_v32 = vadd.f32 %v2378_v30, %v1157_v31 }
 0x815   : > { %2561 = vmatmul.mubr.msk.f32.vlgmr.msra.gmra.mrb[6].mxu1 %vm600_vm0, %v1164_v32 }
 0x816   : > { %2590 = vmatprep.mubr.msk.f32.mxu1 %vm2893_vm1, %v2894_v13  ;;  %2708 = vmatpush3.bf16.msra.mxu1 %v2707_v7 }
 0x817   : > { %2709 = vmatprep.subr.bf16.mxu1 %v2892_v10 }
 0x81a   : > { %2711 = vmatpush3.bf16.msra.mxu1 %v2710_v11 }
 0x81b   : > { %2593 = vmatprep.subr.mxu1 %v2894_v13 }
 0x8e8   : > { %v1245_v46 = vpop.f32.mrb[6].mxu1 }
 0x8e9   : > { %v1246_v47 = vadd.f32 %v2379_v45, %v1245_v46  ;;  %v2562_v48 = vpop.f32.mrb[7].mxu1 }
 0x8eb   : > { %v1250_v49 = vmul.f32 0.044715, %v1246_v47  ;;  %v1249_v55 = vmul.f32 0.5, %v1246_v47 }
 0x8ed   : > { %v1251_v50 = vmul.f32 %v1250_v49, %v1246_v47 }
 0x8ef   : > { %v1252_v51 = vmul.f32 %v1251_v50, %v1246_v47 }
 0x8f1   : > { %v1253_v52 = vadd.f32 %v1252_v51, %v1246_v47 }
 0x8f3   : > { %v1254_v53 = vmul.f32 0.7978846, %v1253_v52 }
 0x8f5   : > { %2808 = vtanh.f32 %v1254_v53 }
 0x8ff   : > { %v2809_v54 = vpop.eup %2808 }
 0x900   : > { %v1256_v56 = vadd.f32 1.0, %v2809_v54 }
 0x902   : > { %v1257_v57 = vmul.f32 %v1256_v56, %v1249_v55  ;;  %v2398_v55 = vld [vmem:[%s3441_s5 + $0x20] sm:$0xff]  ;;  %v2399_v56 = vld [vmem:[%s3441_s5 + $0x28] sm:$0xff] }
 0x904   : > { %2580 = vmatmul.mubr.msk.f32.vlgmr.msra.gmra.mrb[6].mxu0 %vm1273_vm4, %v1257_v57  ;;  %v2400_v57 = vld [vmem:[%s3441_s5 + $0x30] sm:$0xff] }
 0x905   : > { %2605 = vmatprep.mubr.msk.f32.mxu0 %vm2893_vm1, %v2894_v13 }
 0x9d7   : > { %v1343_v59 = vpop.f32.mrb[6].mxu0 }
 0x9d8   : > { %v1344_v60 = vadd.f32 %v2381_v58, %v1343_v59  ;;  %v2581_v61 = vpop.f32.mrb[7].mxu0  ;;  %v2713_v58 = vpack.c.bf16 %v2399_v56, %v2398_v55  ;;  %v2401_v59 = vld [vmem:[%s3441_s5 + $0x38] sm:$0xff]  ;;  %v2425_v56 = vld [vmem:[%s3448_s12 + $0x1] ss:$0 sm:$0xff] }
 0x9da   : > { %v1347_v62 = vadd.f32 %v1344_v60, %v1164_v32  ;;  %v2716_v60 = vpack.c.bf16 %v2401_v59, %v2400_v57 }
 0x9dc   : > { %v1350_v63 = vsel %vm600_vm0, %v1347_v62, 0.0 }
 0x9dd   : > { %1351 = vadd.xlane.f32.xlu1 %v1350_v63 }
 0xa6a   : > { %v1352_v0 = vpop.xlane.xlu1 %1351 }
 0xa6b   : > { %v1353_v1 = vmul.f32 0.03125, %v1352_v0 }
 0xa6d   : > { %v1354_v2 = vsub.f32 %v1347_v62, %v1353_v1 }
 0xa6f   : > { %v1355_v3 = vmul.f32 %v1354_v2, %v1354_v2 }
 0xa71   : > { %v1356_v4 = vsel %vm600_vm0, %v1355_v3, 0.0  ;;  %v2403_v3 = vld [vmem:[%s3442_s6 + $0x1] ss:$0 sm:$0xff] }
 0xa72   : > { %1357 = vadd.xlane.f32.xlu1 %v1356_v4 }
 0xaff   : > { %v1358_v12 = vpop.xlane.xlu1 %1357 }
 0xb00   : > { %v1359_v14 = vmul.f32 0.03125, %v1358_v12 }
 0xb02   : > { %v1360_v15 = vadd.f32 1e-12, %v1359_v14 }
 0xb04   : > { %2810 = vrsqrt.f32 %v1360_v15 }
 0xb0e   : > { %v2811_v16 = vpop.eup %2810 }
 0xb0f   : > { %v1362_v18 = vmul.f32 %v2811_v16, %v1354_v2  ;;  %v2409_v16 = vld [vmem:[%s3445_s9 + $0x20] sm:$0xff] }
 0xb11   : > { %v1369_v20 = vmul.f32 %v2383_v17, %v1362_v18  ;;  %v2410_v17 = vld [vmem:[%s3445_s9 + $0x28] sm:$0xff] }
 0xb12   : > { %v2719_v18 = vpack.c.bf16 %v2410_v17, %v2409_v16  ;;  %v2430_v17 = vld [vmem:[%s3450_s14 + $0x1] ss:$0 sm:$0xff] }
 0xb13   : > { %v3226_v21 = vadd.f32 %v2384_v19, %v1369_v20  ;;  %v2411_v19 = vld [vmem:[%s3445_s9 + $0x30] sm:$0xff]  ;;  %v2412_v20 = vld [vmem:[%s3445_s9 + $0x38] sm:$0xff] }
 0xb15   : > { %2591 = vmatmul.mubr.msk.f32.vlgmr.msra.gmra.mrb[8].mxu1 %vm600_vm0, %v3226_v21 }
 0xb16   : > { %2595 = vmatprep.mubr.msk.f32.mxu1 %vm2893_vm1, %v2894_v13 }
 0xbe8   : > { %v1459_v23 = vpop.f32.mrb[8].mxu1 }
 0xbe9   : > { %v1460_v24 = vadd.f32 %v2390_v22, %v1459_v23  ;;  %v2592_v25 = vpop.f32.mrb[9].mxu1 }
 0xbeb   : > { %1630 = vrot.lane.b32.xlu1 %v1460_v24, %s3484_s25  ;;  %1464 = vrot.lane.b32.xlu0 %v1460_v24, %s3485_s29  ;;  %s2433_s29 = sshll.u32 %s3023_s1, 4  ;;  %s2901_s1 = smov [#allocation2]  }
 0xbec   : > { %s3394_s26 = scalar_lea.hbm %s3455_s19, %s2433_s29  ;;  %s2832_s25 = sshll.u32 %s2901_s1, 4  ;;  %s2833_s25 = int_to_ptr.vmem [resolvable:$false] %s2832_s25 }
 0xbed   : > { %s2834_s4 = scalar_lea.vmem %s2833_s25, 32 }
 0xbef   : > { %1628 = vrot.lane.b32.xlu1 %v1460_v24, %s3486_s27  ;;  %s592_s27 = scalar_lea.vmem [#allocation2], %s591_s24 }
 0xc5d   : > { %v1631_v26 = vpop.permute.xlu1 %1630  ;;  %v1465_v27 = vpop.permute.xlu0 %1464 }
 0xc5e   : > { %2594 = vmatpush3.xpose.msk.msra.mxu1 %vm716_vm2, %v1465_v27  ;;  %2604 = vmatpush3.xpose.msk.msra.mxu0 %vm716_vm2, %v1631_v26  ;;  %v2407_v26 = vld [vmem:[%s3443_s7 + $0x1] ss:$0 sm:$0xff] }
 0xc5f   : > { %2598 = vmatprep.subr.mxu1 %v2894_v13  ;;  %2712 = vmatprep.subr.bf16.mxu0 %v2892_v10 }
 0xc61   : > { %v1629_v28 = vpop.permute.xlu1 %1628  ;;  %2596 = vmatmul.mubr.msk.f32.vlgmr.msra.gmra.mrb[10].mxu1 %vm716_vm2, %v1460_v24 }
 0xc62   : > { %2606 = vmatmul.mubr.msk.f32.vlgmr.msra.gmra.mrb[8].mxu0 %vm716_vm2, %v1629_v28  ;;  %2600 = vmatprep.mubr.msk.f32.mxu1 %vm2893_vm1, %v2894_v13  ;;  %v2408_v28 = vld [vmem:[%s3444_s8 + $0x1] ss:$0 sm:$0xff] }
 0xc63   : > { %2621 = vmatprep.mubr.msk.f32.mxu0 %vm2893_vm1, %v2894_v13  ;;  %2714 = vmatpush3.bf16.msra.mxu0 %v2713_v58 }
 0xc64   : > { %2715 = vmatprep.subr.bf16.mxu0 %v2892_v10 }
 0xc67   : > { %2717 = vmatpush3.bf16.msra.mxu0 %v2716_v60 }
 0xc68   : > { %2724 = vmatprep.subr.bf16.mxu0 %v2892_v10 }
 0xd34   : > { %v1536_v29 = vpop.f32.mrb[10].mxu1 }
 0xd35   : > { %v1540_v30 = vmul.f32 0.25, %v1536_v29  ;;  %v2597_v31 = vpop.f32.mrb[11].mxu1  ;;  %v1702_v32 = vpop.f32.mrb[8].mxu0 }
 0xd36   : > { %v1706_v33 = vmul.f32 0.25, %v1702_v32  ;;  %v2607_v34 = vpop.f32.mrb[9].mxu0  ;;  %v2416_v31 = vld [vmem:[%s3447_s11 + $0x40] sm:$0xff]  ;;  %v2417_v32 = vld [vmem:[%s3447_s11 + $0x48] sm:$0xff] }
 0xd37   : > { %v1541_v35 = vsel %vm792_vm3, %v1540_v30, -inf  ;;  %v2418_v34 = vld [vmem:[%s3447_s11 + $0x50] sm:$0xff] }
 0xd38   : > { %1542 = vmax.xlane.f32.xlu0 %v1541_v35  ;;  %v1707_v36 = vsel %vm792_vm3, %v1706_v33, -inf  ;;  %v2419_v35 = vld [vmem:[%s3447_s11 + $0x58] sm:$0xff] }
 0xd39   : > { %1708 = vmax.xlane.f32.xlu1 %v1707_v36  ;;  %v2728_v36 = vpack.c.bf16 %v2419_v35, %v2418_v34 }
 0xd4a   : > { %1552 = vrot.lane.b32.xlu1 %v1460_v24, %s3487_s22  ;;  %s2305_s22 = sshll.u32 %s592_s27, 4  ;;  %s3396_s22 = int_to_ptr.vmem [resolvable:$true] %s2305_s22 }
 0xd4b   : > { %s2828_s28 = scalar_lea.vmem %s3396_s22, 16  ;;  %p2835_p0 = scmp.lt.s32.totalorder %s3396_s22, %s2833_s25 }
 0xd4c   : > { %p2829_p11 = scmp.ne.s32.totalorder %s3396_s22, %s2828_s28  ;;  %p2836_p1 = scmp.lt.s32.totalorder %s2834_s4, %s2828_s28 }
 0xd4e   : > { %p2830_p12 = pnand %p2829_p11, %p3040_p5  ;;  %p2837_p2 = por %p2836_p1, %p2835_p0 }
 0xd50   : > { %p2831_p13 = pneg %p2830_p12 }
 0xd52   : > { %p2838_p3 = pnand %p2837_p2, %p2831_p13 }
 0xdc5   : > { %v1543_v37 = vpop.xlane.xlu0 %1542 }
 0xdc6   : > { %v1544_v38 = vsub.f32 %v1540_v30, %v1543_v37  ;;  %v1709_v39 = vpop.xlane.xlu1 %1708  ;;  %v2420_v37 = vld [vmem:[%s3447_s11 + $0x60] sm:$0xff] }
 0xdc7   : > { %v1710_v40 = vsub.f32 %v1706_v33, %v1709_v39  ;;  %v2725_v33 = vpack.c.bf16 %v2417_v32, %v2416_v31 }
 0xdc8   : > { %v1545_v41 = vmul.f32 1.442695, %v1544_v38  ;;  %v2421_v38 = vld [vmem:[%s3447_s11 + $0x68] sm:$0xff] }
 0xdc9   : > { %v1711_v42 = vmul.f32 1.442695, %v1710_v40  ;;  %v2731_v39 = vpack.c.bf16 %v2421_v38, %v2420_v37  ;;  %v2422_v40 = vld [vmem:[%s3447_s11 + $0x70] sm:$0xff] }
 0xdca   : > { %2812 = vpow2.f32 %v1545_v41  ;;  %v1553_v43 = vpop.permute.xlu1 %1552  ;;  %v2423_v41 = vld [vmem:[%s3447_s11 + $0x78] sm:$0xff] }
 0xdcb   : > { %2599 = vmatpush3.msra.mxu1 %v1553_v43  ;;  %2814 = vpow2.f32 %v1711_v42  ;;  %v2734_v42 = vpack.c.bf16 %v2423_v41, %v2422_v40  ;;  %v2414_v43 = vld [vmem:[%s3446_s10 + $0x1] ss:$0 sm:$0xff] }
 0xdcc   : > { %2608 = vmatprep.subr.mxu1 %v2894_v13 }
 0xdd4   : > { %v2813_v44 = vpop.eup %2812 }
 0xdd5   : > { %v1547_v45 = vsel %vm792_vm3, %v2813_v44, 0.0  ;;  %v2815_v46 = vpop.eup %2814 }
 0xdd6   : > { %1548 = vadd.xlane.f32.xlu0 %v1547_v45  ;;  %v1713_v47 = vsel %vm792_vm3, %v2815_v46, 0.0 }
 0xdda   : > { %1714 = vadd.xlane.f32.xlu0 %v1713_v47 }
 0xdf0   : > { %1718 = vrot.lane.b32.xlu0 %v1460_v24, %s3488_s23  ;;  %s3489_s23 = smov 16  }
 0xe63   : > { %v1549_v48 = vpop.xlane.xlu0 %1548 }
 0xe64   : > { %2816 = vrcp.f32 %v1549_v48 }
 0xe67   : > { %v1715_v49 = vpop.xlane.xlu0 %1714 }
 0xe68   : > { %2818 = vrcp.f32 %v1715_v49 }
 0xe6b   : > { %v1719_v52 = vpop.permute.xlu0 %1718 }
 0xe6e   : > { %v2817_v50 = vpop.eup %2816 }
 0xe6f   : > { %v1551_v51 = vmul.f32 %v2817_v50, %v2813_v44 }
 0xe71   : > { %2601 = vmatmul.mubr.msk.f32.vlgmr.msra.gmra.mrb[12].mxu1 %vm792_vm3, %v1551_v51 }
 0xe72   : > { %v2819_v53 = vpop.eup %2818  ;;  %2609 = vmatpush3.msra.mxu1 %v1719_v52  ;;  %2610 = vmatprep.mubr.msk.f32.mxu1 %vm2893_vm1, %v2894_v13 }
 0xe73   : > { %v1717_v54 = vmul.f32 %v2819_v53, %v2815_v46  ;;  %2718 = vmatprep.subr.bf16.mxu1 %v2892_v10 }
 0xe75   : > { %2611 = vmatmul.mubr.msk.f32.vlgmr.msra.gmra.mrb[14].mxu1 %vm792_vm3, %v1717_v54 }
 0xe76   : > { %2632 = vmatprep.mubr.msk.f32.mxu1 %vm2893_vm1, %v2894_v13  ;;  %2720 = vmatpush3.bf16.msra.mxu1 %v2719_v18 }
 0xe77   : > { %2721 = vmatprep.subr.bf16.mxu1 %v2892_v10 }
 0xf44   : > { %v1624_v61 = vpop.f32.mrb[12].mxu1 }
 0xf45   : > { %v2602_v62 = vpop.f32.mrb[13].mxu1 }
 0xf48   : > { %v1790_v63 = vpop.f32.mrb[14].mxu1 }
 0xf49   : > { %1795 = vrot.lane.b32.xlu1 %v1790_v63, %s3489_s23  ;;  %v2612_v0 = vpop.f32.mrb[15].mxu1 }
 0xfbb   : > { %v1796_v1 = vpop.permute.xlu1 %1795 }
 0xfbc   : > { %v1798_v2 = vsel %vm716_vm2, %v1624_v61, %v1796_v1 }
 0xfbd   : > { %2622 = vmatmul.mubr.msk.f32.vlgmr.msra.gmra.mrb[10].mxu0 %vm600_vm0, %v1798_v2 }
 0xfbe   : > { %2651 = vmatprep.mubr.msk.f32.mxu0 %vm2893_vm1, %v2894_v13  ;;  %2726 = vmatpush3.bf16.msra.mxu0 %v2725_v33 }
 0xfbf   : > { %2727 = vmatprep.subr.bf16.mxu0 %v2892_v10 }
 0xfc2   : > { %2729 = vmatpush3.bf16.msra.mxu0 %v2728_v36 }
 0xfc3   : > { %2730 = vmatprep.subr.bf16.mxu0 %v2892_v10 }
 0xfc6   : > { %2732 = vmatpush3.bf16.msra.mxu0 %v2731_v39 }
 0xfc7   : > { %2733 = vmatprep.subr.bf16.mxu0 %v2892_v10 }
 0xfca   : > { %2735 = vmatpush3.bf16.msra.mxu0 %v2734_v42 }
0x1090   : > { %v1881_v4 = vpop.f32.mrb[10].mxu0 }
0x1091   : > { %v1882_v5 = vadd.f32 %v2403_v3, %v1881_v4  ;;  %v2623_v6 = vpop.f32.mrb[11].mxu0  ;;  %v2134_v3 = vld [vmem:[%s3451_s15] sm:$0xff]  ;;  %v2135_v4 = vld [vmem:[%s3451_s15 + $0x8] sm:$0xff] }
0x1092   : > { %v2136_v6 = vld [vmem:[%s3451_s15 + $0x10] sm:$0xff] }
0x1093   : > { %v1885_v7 = vadd.f32 %v1882_v5, %v3226_v21  ;;  %v2722_v21 = vpack.c.bf16 %v2412_v20, %v2411_v19  ;;  %v2737_v5 = vpack.c.bf16 %v2135_v4, %v2134_v3  ;;  %v2213_v20 = vld [vmem:[%s3453_s17] sm:$0xff] }
0x1095   : > { %v1890_v8 = vsel %vm600_vm0, %v1885_v7, 0.0  ;;  %2723 = vmatpush3.bf16.msra.mxu1 %v2722_v21  ;;  %v2214_v21 = vld [vmem:[%s3453_s17 + $0x8] sm:$0xff] }
0x1096   : > { %1891 = vadd.xlane.f32.xlu1 %v1890_v8  ;;  %2736 = vmatprep.subr.bf16.mxu1 %v2892_v10 }
0x1123   : > { %v1892_v9 = vpop.xlane.xlu1 %1891 }
0x1124   : > { %v1893_v11 = vmul.f32 0.03125, %v1892_v9 }
0x1126   : > { %v1894_v12 = vsub.f32 %v1885_v7, %v1893_v11  ;;  %v2137_v7 = vld [vmem:[%s3451_s15 + $0x18] sm:$0xff] }
0x1127   : > { %v2740_v8 = vpack.c.bf16 %v2137_v7, %v2136_v6 }
0x1128   : > { %v1895_v14 = vmul.f32 %v1894_v12, %v1894_v12 }
0x112a   : > { %v1896_v15 = vsel %vm600_vm0, %v1895_v14, 0.0 }
0x112b   : > { %1897 = vadd.xlane.f32.xlu0 %v1896_v15  ;;  %v2429_v15 = vld [vmem:[%s3449_s13 + $0x1] ss:$0 sm:$0xff] }
0x11b8   : > { %v1898_v22 = vpop.xlane.xlu0 %1897 }
0x11b9   : > { %v1899_v23 = vmul.f32 0.03125, %v1898_v22  ;;  %v2215_v22 = vld [vmem:[%s3453_s17 + $0x10] sm:$0xff] }
0x11bb   : > { %v1900_v24 = vadd.f32 1e-12, %v1899_v23  ;;  %v2743_v23 = vpack.c.bf16 %v2214_v21, %v2213_v20 }
0x11bd   : > { %2820 = vrsqrt.f32 %v1900_v24  ;;  %v2216_v24 = vld [vmem:[%s3453_s17 + $0x18] sm:$0xff] }
0x11c7   : > { %v2821_v25 = vpop.eup %2820 }
0x11c8   : > { %v1902_v27 = vmul.f32 %v2821_v25, %v1894_v12  ;;  %v2138_v25 = vld [vmem:[%s3452_s16] sm:$0x1] }
0x11ca   : > { %v1909_v29 = vmul.f32 %v2407_v26, %v1902_v27 }
0x11cc   : > { %v1916_v30 = vadd.f32 %v2408_v28, %v1909_v29 }
0x11ce   : > { %2633 = vmatmul.mubr.msk.f32.vlgmr.msra.gmra.mrb[16].mxu1 %vm600_vm0, %v1916_v30 }
0x11cf   : > { %2662 = vmatprep.mubr.msk.f32.mxu1 %vm2893_vm1, %v2894_v13  ;;  %2738 = vmatpush3.bf16.msra.mxu1 %v2737_v5 }
0x11d0   : > { %2739 = vmatprep.subr.bf16.mxu1 %v2892_v10 }
0x11d3   : > { %2741 = vmatpush3.bf16.msra.mxu1 %v2740_v8 }
0x11d4   : > { %2742 = vmatprep.subr.bf16.mxu1 %v2892_v10 }
0x12a1   : > { %v1999_v44 = vpop.f32.mrb[16].mxu1 }
0x12a2   : > { %v2000_v45 = vadd.f32 %v2414_v43, %v1999_v44  ;;  %v2634_v46 = vpop.f32.mrb[17].mxu1 }
0x12a4   : > { %v2004_v47 = vmul.f32 0.044715, %v2000_v45  ;;  %v2003_v53 = vmul.f32 0.5, %v2000_v45 }
0x12a6   : > { %v2005_v48 = vmul.f32 %v2004_v47, %v2000_v45 }
0x12a8   : > { %v2006_v49 = vmul.f32 %v2005_v48, %v2000_v45 }
0x12aa   : > { %v2007_v50 = vadd.f32 %v2006_v49, %v2000_v45 }
0x12ac   : > { %v2008_v51 = vmul.f32 0.7978846, %v2007_v50 }
0x12ae   : > { %2822 = vtanh.f32 %v2008_v51 }
0x12b8   : > { %v2823_v52 = vpop.eup %2822 }
0x12b9   : > { %v2010_v54 = vadd.f32 1.0, %v2823_v52 }
0x12bb   : > { %v2011_v55 = vmul.f32 %v2010_v54, %v2003_v53 }
0x12bd   : > { %2652 = vmatmul.mubr.msk.f32.vlgmr.msra.gmra.mrb[12].mxu0 %vm1273_vm4, %v2011_v55 }
0x1390   : > { %v2098_v57 = vpop.f32.mrb[12].mxu0 }
0x1391   : > { %v2099_v58 = vadd.f32 %v2425_v56, %v2098_v57  ;;  %v2653_v59 = vpop.f32.mrb[13].mxu0 }
0x1393   : > { %v2102_v60 = vadd.f32 %v2099_v58, %v1916_v30  ;;  %v2217_v30 = vld [vmem:[%s3454_s18] sm:$0x1] }
0x1395   : > { %v2107_v61 = vsel %vm600_vm0, %v2102_v60, 0.0 }
0x1396   : > { %2108 = vadd.xlane.f32.xlu0 %v2107_v61 }
0x1423   : > { %v2109_v62 = vpop.xlane.xlu0 %2108 }
0x1424   : > { %v2110_v63 = vmul.f32 0.03125, %v2109_v62 }
0x1426   : > { %v2111_v0 = vsub.f32 %v2102_v60, %v2110_v63 }
0x1428   : > { %v2112_v1 = vmul.f32 %v2111_v0, %v2111_v0 }
0x142a   : > { %v2113_v2 = vsel %vm600_vm0, %v2112_v1, 0.0 }
0x142b   : > { %2114 = vadd.xlane.f32.xlu1 %v2113_v2 }
0x14b8   : > { %v2115_v9 = vpop.xlane.xlu1 %2114 }
0x14b9   : > { %v2116_v11 = vmul.f32 0.03125, %v2115_v9 }
0x14bb   : > { %v2117_v12 = vadd.f32 1e-12, %v2116_v11 }
0x14bd   : > { %2824 = vrsqrt.f32 %v2117_v12 }
0x14c7   : > { %v2825_v14 = vpop.eup %2824 }
0x14c8   : > { %v2119_v16 = vmul.f32 %v2825_v14, %v2111_v0 }
0x14ca   : > { %v2126_v18 = vmul.f32 %v2429_v15, %v2119_v16 }
0x14cc   : > { %v2133_v19 = vadd.f32 %v2430_v17, %v2126_v18 }
0x14ce   : > { %2663 = vmatmul.mubr.msk.f32.vlgmr.msra.gmra.mrb[18].mxu1 %vm600_vm0, %v2133_v19 }
0x14cf   : > { %2673 = vmatprep.mubr.msk.f32.mxu1 %vm2893_vm1, %v2894_v13  ;;  %2744 = vmatpush3.bf16.msra.mxu1 %v2743_v23  ;;  %v2746_v13 = vpack.c.bf16 %v2216_v24, %v2215_v22 }
0x14d0   : > { %2745 = vmatprep.subr.bf16.mxu1 %v2892_v10 }
0x14d3   : > { %2747 = vmatpush3.bf16.msra.mxu1 %v2746_v13 }
0x15a1   : > { %v2208_v26 = vpop.f32.mrb[18].mxu1 }
0x15a2   : > { %v2209_v27 = vadd.f32 %v2208_v26, %v2138_v25  ;;  %v2664_v28 = vpop.f32.mrb[19].mxu1 }
0x15a4   : > { %2826 = vtanh.f32 %v2209_v27 }
0x15ae   : > { %v2827_v29 = vpop.eup %2826 }
0x15af   : > { %2674 = vmatmul.mubr.msk.f32.vlgmr.msra.gmra.mrb[20].mxu1 %vm600_vm0, %v2827_v29 }
0x1682   : > { %v2287_v10 = vpop.f32.mrb[20].mxu1 }
0x1683   : > { %v2288_v31 = vadd.f32 %v2287_v10, %v2217_v30  ;;  %v2675_v32 = vpop.f32.mrb[21].mxu1 }
0x1685   : > { %2291 = vst [vmem:[%s592_s27] sm:$0x1] %v2288_v31 }
0x1686   : > { %2841 = shalt.err (!%p2838_p3)
}
0x1687   : > { %s2842_s24 = scalar_lea.hbm %s3394_s26, 16  ;;  %s2846_s23 = scalar_lea.hbm %s3455_s19, 32 }
0x1688   : > { %p2843_p4 = scmp.ne.s32.totalorder %s3394_s26, %s2842_s24  ;;  %p2847_p9 = scmp.lt.u32.totalorder %s3394_s26, %s3455_s19 }
0x1689   : > { %p2848_p10 = scmp.lt.u32.totalorder %s2846_s23, %s2842_s24  ;;  %p2850_p12 = scmp.lt.u32.totalorder %s2842_s24, %s3394_s26 }
0x168a   : > { %p2844_p7 = pnand %p2843_p4, %p3040_p5 }
0x168b   : > { %p2849_p11 = por %p2848_p10, %p2847_p9 }
0x168c   : > { %p2845_p8 = pneg %p2844_p7 }
0x168d   : > { %p2851_p13 = por %p2850_p12, %p2849_p11 }
0x168f   : > { %p2852_p0 = pnand %p2851_p13, %p2845_p8 }
0x1691   : > { %2855 = shalt.err (!%p2852_p0)
}
0x1692   : > { %2748 = dma.vmem_to_hbm [thread:$0]  (%p3040_p5), %s3396_s22, 16, %s3394_s26, %s2293_s2  }
0x1693 PF: > { %p2754_p1 = scmp.ge.s32.totalorder %s2890_s21, 2  ;;  %s2317_s28 = sand.u32 1, %s2878_s0  }
0x1694   : > { %s2318_s25 = scalar_lea.sflag [#allocation3], %s2317_s28 }
0x1695   : > { %p2751_p2 = pnand %p2754_p1, %p3044_p6 }
0x1697   : > { %2873 = dma.done.wait (!%p2751_p2), %s2318_s25, 16  }
0x1698   : > { %2875 = vsyncadd (!%p2751_p2), %s2318_s25, 4294967280  ;;  %s3491_s21 = sld [smem:[#allocation6_spill]]  ;;  %s3492_s24 = sld [smem:[#allocation5_spill]] }
0x1699   : > { %s3493_s20 = sld [smem:[#allocation7_spill]]  ;;  %s3494_s0 = smov %s2882_s30 }
0x169e   : > { %p29_p3 = scmp.ge.s32.totalorder %s3491_s21, 4   ;;  %s3495_s30 = smov %s3492_s24 }
0x16a0   :  { %31 = sbr.rel (!%p29_p3) target bundleno = 9 (0x9), region = 143 }
0x16a7   :  { %2322 = vsyncpa [#allocation3], 1 }
0x16a8   :  { %2324 = vsyncpa [#allocation3 + $0x1], 1 }

</bundles_post_ra>
